<compile_context>
chip_gen: v7x
topology: tpu7x:2x2x1
jax: 0.10.0
libtpu: 0.0.40
codegen_flags: <defaults>
</compile_context>

<pallas_src>
import functools

import jax
import jax.numpy as jnp
from jax import lax
from jax.experimental import pallas as pl
from jax.experimental.pallas import tpu as pltpu


def _round_up(x, m):
    return ((x + m - 1) // m) * m


_SMEM_SPEC = pl.BlockSpec(memory_space=pltpu.MemorySpace.SMEM)


# ------------------------------ Pallas kernels ----------------------------- #
def _vpu_small_matmul(w, p):
    """(R, tm) = w @ p with a tiny static K, computed on the VPU.

    K is 4..16 here, so this is a handful of broadcast FMAs per tile and it
    keeps the MXU (vector-extended slot) free for the big GEMM in the kernel.
    """
    k = w.shape[1]
    acc = w[:, 0:1] * p[0:1, :]
    for i in range(1, k):
        acc = acc + w[:, i:i + 1] * p[i:i + 1, :]
    return acc


def _gemm_prelu_kernel(alpha_ref, w_ref, p_ref, b_ref, o_ref):
    # o = PReLU(w @ p + b); pixels on the lane axis, alpha in SMEM.
    acc = jnp.dot(w_ref[...], p_ref[...], preferred_element_type=jnp.float32,
                  precision=lax.Precision.HIGHEST)
    acc = acc + b_ref[...]
    o_ref[...] = jnp.where(acc >= 0.0, acc, alpha_ref[0] * acc)


def _dual_gemm_prelu_kernel(subtract, alpha_ref, wa_ref, pa_ref, ba_ref,
                            wb_ref, pb_ref, bb_ref, o_ref):
    # o = PReLU(wa @ pa + ba) +/- PReLU(wb @ pb + bb)
    # side A: (block-diagonal) 1x1 conv  -> VPU broadcast FMAs
    # side B: big k*k conv / deconv GEMM -> MXU
    ya = _vpu_small_matmul(wa_ref[...], pa_ref[...]) + ba_ref[...]
    ya = jnp.where(ya >= 0.0, ya, alpha_ref[0] * ya)
    yb = jnp.dot(wb_ref[...], pb_ref[...], preferred_element_type=jnp.float32,
                 precision=lax.Precision.HIGHEST)
    yb = yb + bb_ref[...]
    yb = jnp.where(yb >= 0.0, yb, alpha_ref[1] * yb)
    o_ref[...] = ya - yb if subtract else ya + yb


# ------------------------------ call wrappers ------------------------------ #
def _pick_tiling(M, tm_pref=1024):
    """Pad M only to a multiple of 128; allow a partial last tile."""
    Mp = _round_up(M, 128)
    tm = min(tm_pref, Mp)
    if Mp > 128 and pl.cdiv(Mp, tm) < 2:
        # >= 2 grid steps on the parallel axis so v7x's two TCs both get work.
        tm = _round_up(pl.cdiv(Mp, 2), 128)
    return tm, Mp, pl.cdiv(Mp, tm)


def _pad_m(a, Mp):
    M = a.shape[-1]
    if Mp == M:
        return a
    return jnp.pad(a, [(0, 0)] * (a.ndim - 1) + [(0, Mp - M)])


def gemm_prelu(w, b, alpha, patchesT, tm_pref=1024):
    """(Cout, M) = PReLU(w @ patchesT + b) with pixels on the lane axis."""
    Cout, K = w.shape
    M = patchesT.shape[1]
    tm, Mp, gm = _pick_tiling(M, tm_pref)
    pT = _pad_m(patchesT.astype(jnp.float32), Mp)
    out = pl.pallas_call(
        _gemm_prelu_kernel,
        out_shape=jax.ShapeDtypeStruct((Cout, Mp), jnp.float32),
        grid=(gm,),
        in_specs=[
            _SMEM_SPEC,                                      # PReLU slope
            pl.BlockSpec((Cout, K), lambda i: (0, 0)),       # weight
            pl.BlockSpec((K, tm), lambda i: (0, i)),         # patch tile
            pl.BlockSpec((Cout, 1), lambda i: (0, 0)),       # bias
        ],
        out_specs=pl.BlockSpec((Cout, tm), lambda i: (0, i)),
        compiler_params=pltpu.CompilerParams(dimension_semantics=("parallel",)),
        cost_estimate=pl.CostEstimate(
            flops=2 * Cout * K * Mp, transcendentals=0,
            bytes_accessed=4 * (Cout * K + K * Mp + 2 * Cout * Mp)),
    )(jnp.asarray(alpha, jnp.float32).reshape(1),
      w.astype(jnp.float32), pT, b.reshape(Cout, 1).astype(jnp.float32))
    return out[:, :M]


def dual_gemm_prelu(wa, ba, paT, wb, bb, pbT, alphas, subtract, tm_pref=1024):
    """(R, M) = PReLU(wa@pa+ba) +/- PReLU(wb@pb+bb); shared pixel (lane) axis."""
    R, Ka = wa.shape
    Kb = wb.shape[1]
    assert wb.shape[0] == R
    M = paT.shape[1]
    assert pbT.shape[1] == M
    tm, Mp, gm = _pick_tiling(M, tm_pref)
    pa = _pad_m(paT.astype(jnp.float32), Mp)
    pb = _pad_m(pbT.astype(jnp.float32), Mp)
    a2 = jnp.stack([jnp.asarray(alphas[0], jnp.float32),
                    jnp.asarray(alphas[1], jnp.float32)])
    out = pl.pallas_call(
        functools.partial(_dual_gemm_prelu_kernel, subtract),
        out_shape=jax.ShapeDtypeStruct((R, Mp), jnp.float32),
        grid=(gm,),
        in_specs=[
            _SMEM_SPEC,                                      # 2 PReLU slopes
            pl.BlockSpec((R, Ka), lambda i: (0, 0)),         # small (1x1) W
            pl.BlockSpec((Ka, tm), lambda i: (0, i)),        # small-side pixels
            pl.BlockSpec((R, 1), lambda i: (0, 0)),          # bias A
            pl.BlockSpec((R, Kb), lambda i: (0, 0)),         # big conv/deconv W
            pl.BlockSpec((Kb, tm), lambda i: (0, i)),        # big-side patches
            pl.BlockSpec((R, 1), lambda i: (0, 0)),          # bias B
        ],
        out_specs=pl.BlockSpec((R, tm), lambda i: (0, i)),
        compiler_params=pltpu.CompilerParams(dimension_semantics=("parallel",)),
        cost_estimate=pl.CostEstimate(
            flops=2 * R * (Ka + Kb) * Mp, transcendentals=0,
            bytes_accessed=4 * ((Ka + Kb) * Mp + R * (Ka + Kb) + 2 * R * Mp)),
    )(a2, wa.astype(jnp.float32), pa, ba.reshape(R, 1).astype(jnp.float32),
      wb.astype(jnp.float32), pb, bb.reshape(R, 1).astype(jnp.float32))
    return out[:, :M]


# ------------------------------ JAX glue ----------------------------------- #
def _nchw_to_pixT(x_nchw):
    """NCHW -> (C, N*H*W), column order (n, h, w)."""
    N, C, H, W = x_nchw.shape
    return jnp.transpose(x_nchw.reshape(N, C, H * W), (1, 0, 2)).reshape(C, N * H * W)


def _pixT_to_nchw(pT, N, H, W):
    C = pT.shape[0]
    return jnp.transpose(pT.reshape(C, N, H, W), (1, 0, 2, 3))


def _im2colT(x_nchw, k, stride, padding):
    """Transposed im2col: (k*k*C, N*Ho*Wo); rows (di,dj,c), cols (n,ho,wo)."""
    x = jnp.transpose(x_nchw, (0, 2, 3, 1))                     # NHWC
    if padding:
        x = jnp.pad(x, ((0, 0), (padding, padding), (padding, padding), (0, 0)))
    N, H, W, C = x.shape
    Ho = (H - k) // stride + 1
    Wo = (W - k) // stride + 1
    taps = []
    for di in range(k):
        for dj in range(k):
            taps.append(x[:, di:di + (Ho - 1) * stride + 1:stride,
                          dj:dj + (Wo - 1) * stride + 1:stride, :])
    p = jnp.stack(taps, axis=0)                                 # (k*k, N, Ho, Wo, C)
    p = jnp.transpose(p, (0, 4, 1, 2, 3))                       # (k*k, C, N, Ho, Wo)
    return p.reshape(k * k * C, N * Ho * Wo), (N, Ho, Wo)


def _conv_weightT(w_oihw):
    """OIHW -> (Cout, kh*kw*Cin), column order (kh, kw, cin)."""
    Cout, Cin, kh, kw = w_oihw.shape
    return jnp.transpose(w_oihw, (0, 2, 3, 1)).reshape(Cout, kh * kw * Cin)


def _deconv_subpixel_weightsT(w_iohw, stride, padding, d_min, d_max):
    """ConvTranspose2d weight (Cin,Cout,k,k) -> class-stacked (s*s*Cout, T*T*Cin)."""
    Cin, Cout, k, _ = w_iohw.shape
    zeros = jnp.zeros((Cin, Cout), w_iohw.dtype)
    cls_mats = []
    for r in range(stride):
        for c in range(stride):
            taps = []
            for dh in range(d_min, d_max + 1):
                for dw in range(d_min, d_max + 1):
                    ki = r + padding + stride * dh
                    kj = c + padding + stride * dw
                    if 0 <= ki < k and 0 <= kj < k:
                        taps.append(w_iohw[:, :, ki, kj])       # (Cin, Cout)
                    else:
                        taps.append(zeros)
            tw = jnp.stack(taps, axis=0)                        # (T*T, Cin, Cout)
            cls_mats.append(jnp.transpose(tw, (2, 0, 1)).reshape(Cout, -1))
    return jnp.concatenate(cls_mats, axis=0)                    # (s*s*Cout, T*T*Cin)


def _deconv_subpixel_patchesT(x_cnhw, Hq, Wq, d_min, d_max):
    """LR input (C,N,H,W) -> (T*T*C, N*Hq*Wq) tap matrix shared by all classes."""
    C, N, H, W = x_cnhw.shape
    pad_lo = d_max
    pad_hi_h = max(0, Hq - 1 - d_min - (H - 1))
    pad_hi_w = max(0, Wq - 1 - d_min - (W - 1))
    xp = jnp.pad(x_cnhw, ((0, 0), (0, 0),
                          (pad_lo, pad_hi_h), (pad_lo, pad_hi_w)))
    taps = []
    for dh in range(d_min, d_max + 1):
        for dw in range(d_min, d_max + 1):
            taps.append(xp[:, :, d_max - dh:d_max - dh + Hq,
                           d_max - dw:d_max - dw + Wq])
    p = jnp.stack(taps, axis=0)                                 # (T*T, C, N, Hq, Wq)
    return p.reshape(-1, N * Hq * Wq)


def _parity_pixelsT(x_nchw, stride):
    """Row-stacked parity pixel matrices (s*s*C, N*Hq*Wq), class order (r, c)."""
    mats = []
    for r in range(stride):
        for c in range(stride):
            mats.append(_nchw_to_pixT(x_nchw[:, :, r::stride, c::stride]))
    return jnp.concatenate(mats, axis=0)


def _patchesT_from_parity(res_stacked, k, stride, padding, C, N, Hq, Wq):
    """im2col patches of the HR image for a k x k / stride-s conv, built
    directly from its s*s row-stacked parity-class LR grids (class order (r, c),
    rows within a class = channels).  The HR tensor is never materialized."""
    s = stride
    res = res_stacked.reshape(s, s, C, N, Hq, Wq)
    offs = [(d - padding) // s for d in range(k)]
    pad_lo = max(0, -min(offs))
    pad_hi = max(0, max(offs))
    res_p = jnp.pad(res, [(0, 0)] * 4 + [(pad_lo, pad_hi)] * 2)
    taps = []
    for di in range(k):
        rp = (di - padding) % s
        ai = (di - padding) // s + pad_lo
        for dj in range(k):
            cp = (dj - padding) % s
            bj = (dj - padding) // s + pad_lo
            taps.append(res_p[rp, cp, :, :, ai:ai + Hq, bj:bj + Wq])
    p = jnp.stack(taps, axis=0)                                 # (k*k, C, N, Hq, Wq)
    return p.reshape(k * k * C, N * Hq * Wq)


# ------------------------------- DownBlock --------------------------------- #
def init_downblock_params(key, cin, cout, k):
    ks = jax.random.split(key, 10)

    def w_init(kk, shape):
        fan_in = shape[1] * shape[2] * shape[3]
        return jax.random.normal(kk, shape, jnp.float32) * (1.0 / fan_in) ** 0.5

    return {
        "conv1_w": w_init(ks[0], (cout, cin, k, k)),            # Conv2d (OIHW)
        "conv1_b": jax.random.normal(ks[1], (cout,), jnp.float32) * 0.01,
        "conv1_a": jnp.float32(0.25),
        "conv2_w": jax.random.normal(ks[2], (cout, cout, k, k),  # ConvT (Cin,Cout,kh,kw)
                                     jnp.float32) * (1.0 / (cout * k * k)) ** 0.5,
        "conv2_b": jax.random.normal(ks[3], (cout,), jnp.float32) * 0.01,
        "conv2_a": jnp.float32(0.25),
        "conv3_w": w_init(ks[4], (cout, cout, k, k)),
        "conv3_b": jax.random.normal(ks[5], (cout,), jnp.float32) * 0.01,
        "conv3_a": jnp.float32(0.25),
        "lw1_w": w_init(ks[6], (cout, cin, 1, 1)),
        "lw1_b": jax.random.normal(ks[7], (cout,), jnp.float32) * 0.01,
        "lw1_a": jnp.float32(0.25),
        "lw2_w": w_init(ks[8], (cout, cout, 1, 1)),
        "lw2_b": jax.random.normal(ks[9], (cout,), jnp.float32) * 0.01,
        "lw2_a": jnp.float32(0.25),
    }


def down_block(params, x, stride, padding):
    N, Cin, H, W = x.shape
    Cout, _, k, _ = params["conv1_w"].shape
    s = stride

    # ---- stage 1: lr = PReLU(conv1(x)) ------------------------------------ #
    p1, (_, Ho, Wo) = _im2colT(x, k, s, padding)
    lrT = gemm_prelu(_conv_weightT(params["conv1_w"]), params["conv1_b"],
                     params["conv1_a"], p1)                     # (Cout, N*Ho*Wo)

    # ---- stage 2: residue = PReLU(lw1(x)) - PReLU(deconv2(lr)) ------------ #
    H_out = (Ho - 1) * s - 2 * padding + k
    W_out = (Wo - 1) * s - 2 * padding + k
    d_min = -((s - 1 + padding) // s)
    d_max = (k - 1 - padding) // s
    Hq, Wq = H_out // s, W_out // s
    # sub-pixel decomposition preconditions (hold for ABPN DownBlock configs)
    assert (H_out, W_out) == (H, W) and H_out % s == 0 and W_out % s == 0 \
        and d_max >= 0 and (Hq, Wq) == (Ho, Wo), "unsupported deconv geometry"
    # TODO(synk): add a dilation-based deconv fallback for geometries where
    #   the sub-pixel decomposition does not apply.
    lr_cnhw = lrT.reshape(Cout, N, Ho, Wo)
    pb = _deconv_subpixel_patchesT(lr_cnhw, Hq, Wq, d_min, d_max)   # (T*T*Cout, M)
    wb = _deconv_subpixel_weightsT(params["conv2_w"], s, padding,
                                   d_min, d_max)                    # (s*s*Cout, T*T*Cout)
    pa = _parity_pixelsT(x, s)                                      # (s*s*Cin, M)
    wa = jnp.kron(jnp.eye(s * s, dtype=jnp.float32),
                  params["lw1_w"].reshape(Cout, Cin))               # block-diag 1x1
    res_stacked = dual_gemm_prelu(
        wa, jnp.tile(params["lw1_b"], s * s), pa,
        wb, jnp.tile(params["conv2_b"], s * s), pb,
        (params["lw1_a"], params["conv2_a"]), subtract=True)        # (s*s*Cout, M)

    # ---- stage 3: out = PReLU(lw2(lr)) + PReLU(conv3(residue)) ------------ #
    p3 = _patchesT_from_parity(res_stacked, k, s, padding, Cout, N, Hq, Wq)
    outT = dual_gemm_prelu(
        params["lw2_w"].reshape(Cout, Cout), params["lw2_b"], lrT,
        _conv_weightT(params["conv3_w"]), params["conv3_b"], p3,
        (params["lw2_a"], params["conv3_a"]), subtract=False)       # (Cout, M)
    return _pixT_to_nchw(outT, N, Ho, Wo)


# ------------------------ pure-JAX reference (check) ----------------------- #
def _ref_conv(x, w, b, a, stride, padding):
    out = lax.conv_general_dilated(
        x, w, (stride, stride), [(padding, padding)] * 2,
        dimension_numbers=("NCHW", "OIHW", "NCHW"),
        precision=lax.Precision.HIGHEST)
    out = out + b.reshape(1, -1, 1, 1)
    return jnp.where(out >= 0, out, a * out)


def _ref_deconv(x, w, b, a, stride, padding):
    w_conv = jnp.transpose(w, (1, 0, 2, 3))[:, :, ::-1, ::-1]
    q = w.shape[2] - 1 - padding
    out = lax.conv_general_dilated(
        x, w_conv, (1, 1), [(q, q)] * 2, lhs_dilation=(stride, stride),
        dimension_numbers=("NCHW", "OIHW", "NCHW"),
        precision=lax.Precision.HIGHEST)
    out = out + b.reshape(1, -1, 1, 1)
    return jnp.where(out >= 0, out, a * out)


def _ref_down_block(p, x, s, pd):
    lr = _ref_conv(x, p["conv1_w"], p["conv1_b"], p["conv1_a"], s, pd)
    hr = _ref_deconv(lr, p["conv2_w"], p["conv2_b"], p["conv2_a"], s, pd)
    residue = _ref_conv(x, p["lw1_w"], p["lw1_b"], p["lw1_a"], 1, 0) - hr
    l_residue = _ref_conv(residue, p["conv3_w"], p["conv3_b"], p["conv3_a"], s, pd)
    lr_weight = _ref_conv(lr, p["lw2_w"], p["lw2_b"], p["lw2_a"], 1, 0)
    return lr_weight + l_residue


if __name__ == "__main__":
    # DownBlock(input_size=4, output_size=8, kernel_size=6, stride=2, padding=2)
    cin, cout, k, stride, padding = 4, 8, 6, 2, 2
    key = jax.random.PRNGKey(0)
    kx, kp = jax.random.split(key)
    x = jax.random.normal(kx, (2, cin, 16, 16), jnp.float32)    # NCHW
    params = init_downblock_params(kp, cin, cout, k)

    fwd = jax.jit(lambda p, xx: down_block(p, xx, stride, padding))
    out = jax.block_until_ready(fwd(params, x))
    assert out.shape == (2, cout, 8, 8), out.shape

    ref = jax.block_until_ready(_ref_down_block(params, x, stride, padding))
    err = float(jnp.max(jnp.abs(out - ref)))
    assert jnp.allclose(out, ref, rtol=1e-4, atol=1e-4), err

    print("KERNEL_OK")
</pallas_src>

<mosaic_0001>
module attributes {stable_mosaic.version = 11 : i64} {
  func.func @_gemm_prelu_kernel(%arg0: i32, %arg1: memref<1xf32, #tpu.memory_space<smem>>, %arg2: memref<8x144xf32, #tpu.memory_space<vmem>>, %arg3: memref<144x128xf32, #tpu.memory_space<vmem>>, %arg4: memref<8x1xf32, #tpu.memory_space<vmem>>, %arg5: memref<8x128xf32, #tpu.memory_space<vmem>>) attributes {dimension_semantics = [#tpu.dimension_semantics<parallel>], iteration_bounds = array<i64: 1>, scalar_prefetch = 0 : i64, scratch_operands = 0 : i64, tpu.core_type = #tpu.core_type<tc>, window_params = [{transform_indices = @transform_0, window_bounds = array<i64: 1>}, {pipeline_mode = #tpu.pipeline_mode<synchronous>, transform_indices = @transform_1, window_bounds = array<i64: 8, 144>}, {transform_indices = @transform_2, window_bounds = array<i64: 144, 128>}, {pipeline_mode = #tpu.pipeline_mode<synchronous>, transform_indices = @transform_3, window_bounds = array<i64: 8, 1>}, {transform_indices = @transform_4, window_bounds = array<i64: 8, 128>}]} {
    %c0 = arith.constant 0 : index
    %c0_0 = arith.constant 0 : index
    %0 = vector.load %arg2[%c0, %c0_0] : memref<8x144xf32, #tpu.memory_space<vmem>>, vector<8x144xf32>
    %c0_1 = arith.constant 0 : index
    %c0_2 = arith.constant 0 : index
    %1 = vector.load %arg3[%c0_1, %c0_2] : memref<144x128xf32, #tpu.memory_space<vmem>>, vector<144x128xf32>
    %cst = arith.constant dense<0.000000e+00> : vector<8x128xf32>
    %2 = tpu.matmul %0, %1, %cst {dimension_numbers = #tpu.dot_dimension_numbers<[1], [0], [0], [1], [0, 0, 1, 1], [], []>, precision = #tpu.contract_precision<fp32>} : vector<8x144xf32>, vector<144x128xf32>, vector<8x128xf32> -> vector<8x128xf32>
    %c0_3 = arith.constant 0 : index
    %c0_4 = arith.constant 0 : index
    %3 = vector.load %arg4[%c0_3, %c0_4] : memref<8x1xf32, #tpu.memory_space<vmem>>, vector<8x1xf32>
    %4 = vector.broadcast %3 : vector<8x1xf32> to vector<8x128xf32>
    %5 = arith.addf %2, %4 : vector<8x128xf32>
    %cst_5 = arith.constant 0.000000e+00 : f32
    %6 = vector.broadcast %cst_5 : f32 to vector<8x128xf32>
    %7 = arith.cmpf oge, %5, %6 : vector<8x128xf32>
    %c0_6 = arith.constant 0 : index
    %8 = memref.load %arg1[%c0_6] : memref<1xf32, #tpu.memory_space<smem>>
    %9 = vector.broadcast %8 : f32 to vector<8x128xf32>
    %10 = arith.mulf %9, %5 : vector<8x128xf32>
    %11 = arith.select %7, %5, %10 : vector<8x128xi1>, vector<8x128xf32>
    %c0_7 = arith.constant 0 : index
    %c0_8 = arith.constant 0 : index
    %12 = vector.load %arg5[%c0_7, %c0_8] : memref<8x128xf32, #tpu.memory_space<vmem>>, vector<8x128xf32>
    tpu.vector_store %arg5[%c0_7, %c0_8], %11 {strides = array<i32>} : memref<8x128xf32, #tpu.memory_space<vmem>>, vector<8x128xf32>,
    return
  }
  func.func @transform_0(%arg0: i32) -> i32 {
    %c0_i32 = arith.constant 0 : i32
    %c0_i32_0 = arith.constant 0 : i32
    return %c0_i32 : i32
  }
  func.func @transform_1(%arg0: i32) -> (i32, i32) {
    %c0_i32 = arith.constant 0 : i32
    %c0_i32_0 = arith.constant 0 : i32
    %c0_i32_1 = arith.constant 0 : i32
    return %c0_i32, %c0_i32_0 : i32, i32
  }
  func.func @transform_2(%arg0: i32) -> (i32, i32) {
    %c0_i32 = arith.constant 0 : i32
    %c0_i32_0 = arith.constant 0 : i32
    return %c0_i32, %arg0 : i32, i32
  }
  func.func @transform_3(%arg0: i32) -> (i32, i32) {
    %c0_i32 = arith.constant 0 : i32
    %c0_i32_0 = arith.constant 0 : i32
    %c0_i32_1 = arith.constant 0 : i32
    return %c0_i32, %c0_i32_0 : i32, i32
  }
  func.func @transform_4(%arg0: i32) -> (i32, i32) {
    %c0_i32 = arith.constant 0 : i32
    %c0_i32_0 = arith.constant 0 : i32
    return %c0_i32, %arg0 : i32, i32
  }
}

module attributes {stable_mosaic.version = 11 : i64} {
  func.func @_dual_gemm_prelu_kernel(%arg0: i32, %arg1: memref<2xf32, #tpu.memory_space<smem>>, %arg2: memref<32x16xf32, #tpu.memory_space<vmem>>, %arg3: memref<16x128xf32, #tpu.memory_space<vmem>>, %arg4: memref<32x1xf32, #tpu.memory_space<vmem>>, %arg5: memref<32x72xf32, #tpu.memory_space<vmem>>, %arg6: memref<72x128xf32, #tpu.memory_space<vmem>>, %arg7: memref<32x1xf32, #tpu.memory_space<vmem>>, %arg8: memref<32x128xf32, #tpu.memory_space<vmem>>) attributes {dimension_semantics = [#tpu.dimension_semantics<parallel>], iteration_bounds = array<i64: 1>, scalar_prefetch = 0 : i64, scratch_operands = 0 : i64, tpu.core_type = #tpu.core_type<tc>, window_params = [{transform_indices = @transform_0, window_bounds = array<i64: 2>}, {pipeline_mode = #tpu.pipeline_mode<synchronous>, transform_indices = @transform_1, window_bounds = array<i64: 32, 16>}, {transform_indices = @transform_2, window_bounds = array<i64: 16, 128>}, {pipeline_mode = #tpu.pipeline_mode<synchronous>, transform_indices = @transform_3, window_bounds = array<i64: 32, 1>}, {pipeline_mode = #tpu.pipeline_mode<synchronous>, transform_indices = @transform_4, window_bounds = array<i64: 32, 72>}, {transform_indices = @transform_5, window_bounds = array<i64: 72, 128>}, {pipeline_mode = #tpu.pipeline_mode<synchronous>, transform_indices = @transform_6, window_bounds = array<i64: 32, 1>}, {transform_indices = @transform_7, window_bounds = array<i64: 32, 128>}]} {
    %c0 = arith.constant 0 : index
    %c0_0 = arith.constant 0 : index
    %0 = vector.load %arg2[%c0, %c0_0] : memref<32x16xf32, #tpu.memory_space<vmem>>, vector<32x16xf32>
    %c0_1 = arith.constant 0 : index
    %c0_2 = arith.constant 0 : index
    %1 = vector.load %arg3[%c0_1, %c0_2] : memref<16x128xf32, #tpu.memory_space<vmem>>, vector<16x128xf32>
    %2 = vector.extract_strided_slice %0 {offsets = [0, 0], sizes = [32, 1], strides = [1, 1]} : vector<32x16xf32> to vector<32x1xf32>
    %3 = vector.extract_strided_slice %1 {offsets = [0, 0], sizes = [1, 128], strides = [1, 1]} : vector<16x128xf32> to vector<1x128xf32>
    %4 = vector.broadcast %2 : vector<32x1xf32> to vector<32x128xf32>
    %5 = vector.broadcast %3 : vector<1x128xf32> to vector<32x128xf32>
    %6 = arith.mulf %4, %5 : vector<32x128xf32>
    %7 = vector.extract_strided_slice %0 {offsets = [0, 1], sizes = [32, 1], strides = [1, 1]} : vector<32x16xf32> to vector<32x1xf32>
    %8 = vector.extract_strided_slice %1 {offsets = [1, 0], sizes = [1, 128], strides = [1, 1]} : vector<16x128xf32> to vector<1x128xf32>
    %9 = vector.broadcast %7 : vector<32x1xf32> to vector<32x128xf32>
    %10 = vector.broadcast %8 : vector<1x128xf32> to vector<32x128xf32>
    %11 = arith.mulf %9, %10 : vector<32x128xf32>
    %12 = arith.addf %6, %11 : vector<32x128xf32>
    %13 = vector.extract_strided_slice %0 {offsets = [0, 2], sizes = [32, 1], strides = [1, 1]} : vector<32x16xf32> to vector<32x1xf32>
    %14 = vector.extract_strided_slice %1 {offsets = [2, 0], sizes = [1, 128], strides = [1, 1]} : vector<16x128xf32> to vector<1x128xf32>
    %15 = vector.broadcast %13 : vector<32x1xf32> to vector<32x128xf32>
    %16 = vector.broadcast %14 : vector<1x128xf32> to vector<32x128xf32>
    %17 = arith.mulf %15, %16 : vector<32x128xf32>
    %18 = arith.addf %12, %17 : vector<32x128xf32>
    %19 = vector.extract_strided_slice %0 {offsets = [0, 3], sizes = [32, 1], strides = [1, 1]} : vector<32x16xf32> to vector<32x1xf32>
    %20 = vector.extract_strided_slice %1 {offsets = [3, 0], sizes = [1, 128], strides = [1, 1]} : vector<16x128xf32> to vector<1x128xf32>
    %21 = vector.broadcast %19 : vector<32x1xf32> to vector<32x128xf32>
    %22 = vector.broadcast %20 : vector<1x128xf32> to vector<32x128xf32>
    %23 = arith.mulf %21, %22 : vector<32x128xf32>
    %24 = arith.addf %18, %23 : vector<32x128xf32>
    %25 = vector.extract_strided_slice %0 {offsets = [0, 4], sizes = [32, 1], strides = [1, 1]} : vector<32x16xf32> to vector<32x1xf32>
    %26 = vector.extract_strided_slice %1 {offsets = [4, 0], sizes = [1, 128], strides = [1, 1]} : vector<16x128xf32> to vector<1x128xf32>
    %27 = vector.broadcast %25 : vector<32x1xf32> to vector<32x128xf32>
    %28 = vector.broadcast %26 : vector<1x128xf32> to vector<32x128xf32>
    %29 = arith.mulf %27, %28 : vector<32x128xf32>
    %30 = arith.addf %24, %29 : vector<32x128xf32>
    %31 = vector.extract_strided_slice %0 {offsets = [0, 5], sizes = [32, 1], strides = [1, 1]} : vector<32x16xf32> to vector<32x1xf32>
    %32 = vector.extract_strided_slice %1 {offsets = [5, 0], sizes = [1, 128], strides = [1, 1]} : vector<16x128xf32> to vector<1x128xf32>
    %33 = vector.broadcast %31 : vector<32x1xf32> to vector<32x128xf32>
    %34 = vector.broadcast %32 : vector<1x128xf32> to vector<32x128xf32>
    %35 = arith.mulf %33, %34 : vector<32x128xf32>
    %36 = arith.addf %30, %35 : vector<32x128xf32>
    %37 = vector.extract_strided_slice %0 {offsets = [0, 6], sizes = [32, 1], strides = [1, 1]} : vector<32x16xf32> to vector<32x1xf32>
    %38 = vector.extract_strided_slice %1 {offsets = [6, 0], sizes = [1, 128], strides = [1, 1]} : vector<16x128xf32> to vector<1x128xf32>
    %39 = vector.broadcast %37 : vector<32x1xf32> to vector<32x128xf32>
    %40 = vector.broadcast %38 : vector<1x128xf32> to vector<32x128xf32>
    %41 = arith.mulf %39, %40 : vector<32x128xf32>
    %42 = arith.addf %36, %41 : vector<32x128xf32>
    %43 = vector.extract_strided_slice %0 {offsets = [0, 7], sizes = [32, 1], strides = [1, 1]} : vector<32x16xf32> to vector<32x1xf32>
    %44 = vector.extract_strided_slice %1 {offsets = [7, 0], sizes = [1, 128], strides = [1, 1]} : vector<16x128xf32> to vector<1x128xf32>
    %45 = vector.broadcast %43 : vector<32x1xf32> to vector<32x128xf32>
    %46 = vector.broadcast %44 : vector<1x128xf32> to vector<32x128xf32>
    %47 = arith.mulf %45, %46 : vector<32x128xf32>
    %48 = arith.addf %42, %47 : vector<32x128xf32>
    %49 = vector.extract_strided_slice %0 {offsets = [0, 8], sizes = [32, 1], strides = [1, 1]} : vector<32x16xf32> to vector<32x1xf32>
    %50 = vector.extract_strided_slice %1 {offsets = [8, 0], sizes = [1, 128], strides = [1, 1]} : vector<16x128xf32> to vector<1x128xf32>
    %51 = vector.broadcast %49 : vector<32x1xf32> to vector<32x128xf32>
    %52 = vector.broadcast %50 : vector<1x128xf32> to vector<32x128xf32>
    %53 = arith.mulf %51, %52 : vector<32x128xf32>
    %54 = arith.addf %48, %53 : vector<32x128xf32>
    %55 = vector.extract_strided_slice %0 {offsets = [0, 9], sizes = [32, 1], strides = [1, 1]} : vector<32x16xf32> to vector<32x1xf32>
    %56 = vector.extract_strided_slice %1 {offsets = [9, 0], sizes = [1, 128], strides = [1, 1]} : vector<16x128xf32> to vector<1x128xf32>
    %57 = vector.broadcast %55 : vector<32x1xf32> to vector<32x128xf32>
    %58 = vector.broadcast %56 : vector<1x128xf32> to vector<32x128xf32>
    %59 = arith.mulf %57, %58 : vector<32x128xf32>
    %60 = arith.addf %54, %59 : vector<32x128xf32>
    %61 = vector.extract_strided_slice %0 {offsets = [0, 10], sizes = [32, 1], strides = [1, 1]} : vector<32x16xf32> to vector<32x1xf32>
    %62 = vector.extract_strided_slice %1 {offsets = [10, 0], sizes = [1, 128], strides = [1, 1]} : vector<16x128xf32> to vector<1x128xf32>
    %63 = vector.broadcast %61 : vector<32x1xf32> to vector<32x128xf32>
    %64 = vector.broadcast %62 : vector<1x128xf32> to vector<32x128xf32>
    %65 = arith.mulf %63, %64 : vector<32x128xf32>
    %66 = arith.addf %60, %65 : vector<32x128xf32>
    %67 = vector.extract_strided_slice %0 {offsets = [0, 11], sizes = [32, 1], strides = [1, 1]} : vector<32x16xf32> to vector<32x1xf32>
    %68 = vector.extract_strided_slice %1 {offsets = [11, 0], sizes = [1, 128], strides = [1, 1]} : vector<16x128xf32> to vector<1x128xf32>
    %69 = vector.broadcast %67 : vector<32x1xf32> to vector<32x128xf32>
    %70 = vector.broadcast %68 : vector<1x128xf32> to vector<32x128xf32>
    %71 = arith.mulf %69, %70 : vector<32x128xf32>
    %72 = arith.addf %66, %71 : vector<32x128xf32>
    %73 = vector.extract_strided_slice %0 {offsets = [0, 12], sizes = [32, 1], strides = [1, 1]} : vector<32x16xf32> to vector<32x1xf32>
    %74 = vector.extract_strided_slice %1 {offsets = [12, 0], sizes = [1, 128], strides = [1, 1]} : vector<16x128xf32> to vector<1x128xf32>
    %75 = vector.broadcast %73 : vector<32x1xf32> to vector<32x128xf32>
    %76 = vector.broadcast %74 : vector<1x128xf32> to vector<32x128xf32>
    %77 = arith.mulf %75, %76 : vector<32x128xf32>
    %78 = arith.addf %72, %77 : vector<32x128xf32>
    %79 = vector.extract_strided_slice %0 {offsets = [0, 13], sizes = [32, 1], strides = [1, 1]} : vector<32x16xf32> to vector<32x1xf32>
    %80 = vector.extract_strided_slice %1 {offsets = [13, 0], sizes = [1, 128], strides = [1, 1]} : vector<16x128xf32> to vector<1x128xf32>
    %81 = vector.broadcast %79 : vector<32x1xf32> to vector<32x128xf32>
    %82 = vector.broadcast %80 : vector<1x128xf32> to vector<32x128xf32>
    %83 = arith.mulf %81, %82 : vector<32x128xf32>
    %84 = arith.addf %78, %83 : vector<32x128xf32>
    %85 = vector.extract_strided_slice %0 {offsets = [0, 14], sizes = [32, 1], strides = [1, 1]} : vector<32x16xf32> to vector<32x1xf32>
    %86 = vector.extract_strided_slice %1 {offsets = [14, 0], sizes = [1, 128], strides = [1, 1]} : vector<16x128xf32> to vector<1x128xf32>
    %87 = vector.broadcast %85 : vector<32x1xf32> to vector<32x128xf32>
    %88 = vector.broadcast %86 : vector<1x128xf32> to vector<32x128xf32>
    %89 = arith.mulf %87, %88 : vector<32x128xf32>
    %90 = arith.addf %84, %89 : vector<32x128xf32>
    %91 = vector.extract_strided_slice %0 {offsets = [0, 15], sizes = [32, 1], strides = [1, 1]} : vector<32x16xf32> to vector<32x1xf32>
    %92 = vector.extract_strided_slice %1 {offsets = [15, 0], sizes = [1, 128], strides = [1, 1]} : vector<16x128xf32> to vector<1x128xf32>
    %93 = vector.broadcast %91 : vector<32x1xf32> to vector<32x128xf32>
    %94 = vector.broadcast %92 : vector<1x128xf32> to vector<32x128xf32>
    %95 = arith.mulf %93, %94 : vector<32x128xf32>
    %96 = arith.addf %90, %95 : vector<32x128xf32>
    %c0_3 = arith.constant 0 : index
    %c0_4 = arith.constant 0 : index
    %97 = vector.load %arg4[%c0_3, %c0_4] : memref<32x1xf32, #tpu.memory_space<vmem>>, vector<32x1xf32>
    %98 = vector.broadcast %97 : vector<32x1xf32> to vector<32x128xf32>
    %99 = arith.addf %96, %98 : vector<32x128xf32>
    %cst = arith.constant 0.000000e+00 : f32
    %100 = vector.broadcast %cst : f32 to vector<32x128xf32>
    %101 = arith.cmpf oge, %99, %100 : vector<32x128xf32>
    %c0_5 = arith.constant 0 : index
    %102 = memref.load %arg1[%c0_5] : memref<2xf32, #tpu.memory_space<smem>>
    %103 = vector.broadcast %102 : f32 to vector<32x128xf32>
    %104 = arith.mulf %103, %99 : vector<32x128xf32>
    %105 = arith.select %101, %99, %104 : vector<32x128xi1>, vector<32x128xf32>
    %c0_6 = arith.constant 0 : index
    %c0_7 = arith.constant 0 : index
    %106 = vector.load %arg5[%c0_6, %c0_7] : memref<32x72xf32, #tpu.memory_space<vmem>>, vector<32x72xf32>
    %c0_8 = arith.constant 0 : index
    %c0_9 = arith.constant 0 : index
    %107 = vector.load %arg6[%c0_8, %c0_9] : memref<72x128xf32, #tpu.memory_space<vmem>>, vector<72x128xf32>
    %cst_10 = arith.constant dense<0.000000e+00> : vector<32x128xf32>
    %108 = tpu.matmul %106, %107, %cst_10 {dimension_numbers = #tpu.dot_dimension_numbers<[1], [0], [0], [1], [0, 0, 1, 1], [], []>, precision = #tpu.contract_precision<fp32>} : vector<32x72xf32>, vector<72x128xf32>, vector<32x128xf32> -> vector<32x128xf32>
    %c0_11 = arith.constant 0 : index
    %c0_12 = arith.constant 0 : index
    %109 = vector.load %arg7[%c0_11, %c0_12] : memref<32x1xf32, #tpu.memory_space<vmem>>, vector<32x1xf32>
    %110 = vector.broadcast %109 : vector<32x1xf32> to vector<32x128xf32>
    %111 = arith.addf %108, %110 : vector<32x128xf32>
    %cst_13 = arith.constant 0.000000e+00 : f32
    %112 = vector.broadcast %cst_13 : f32 to vector<32x128xf32>
    %113 = arith.cmpf oge, %111, %112 : vector<32x128xf32>
    %c1 = arith.constant 1 : index
    %114 = memref.load %arg1[%c1] : memref<2xf32, #tpu.memory_space<smem>>
    %115 = vector.broadcast %114 : f32 to vector<32x128xf32>
    %116 = arith.mulf %115, %111 : vector<32x128xf32>
    %117 = arith.select %113, %111, %116 : vector<32x128xi1>, vector<32x128xf32>
    %118 = arith.subf %105, %117 : vector<32x128xf32>
    %c0_14 = arith.constant 0 : index
    %c0_15 = arith.constant 0 : index
    %119 = vector.load %arg8[%c0_14, %c0_15] : memref<32x128xf32, #tpu.memory_space<vmem>>, vector<32x128xf32>
    tpu.vector_store %arg8[%c0_14, %c0_15], %118 {strides = array<i32>} : memref<32x128xf32, #tpu.memory_space<vmem>>, vector<32x128xf32>,
    return
  }
  func.func @transform_0(%arg0: i32) -> i32 {
    %c0_i32 = arith.constant 0 : i32
    %c0_i32_0 = arith.constant 0 : i32
    return %c0_i32 : i32
  }
  func.func @transform_1(%arg0: i32) -> (i32, i32) {
    %c0_i32 = arith.constant 0 : i32
    %c0_i32_0 = arith.constant 0 : i32
    %c0_i32_1 = arith.constant 0 : i32
    return %c0_i32, %c0_i32_0 : i32, i32
  }
  func.func @transform_2(%arg0: i32) -> (i32, i32) {
    %c0_i32 = arith.constant 0 : i32
    %c0_i32_0 = arith.constant 0 : i32
    return %c0_i32, %arg0 : i32, i32
  }
  func.func @transform_3(%arg0: i32) -> (i32, i32) {
    %c0_i32 = arith.constant 0 : i32
    %c0_i32_0 = arith.constant 0 : i32
    %c0_i32_1 = arith.constant 0 : i32
    return %c0_i32, %c0_i32_0 : i32, i32
  }
  func.func @transform_4(%arg0: i32) -> (i32, i32) {
    %c0_i32 = arith.constant 0 : i32
    %c0_i32_0 = arith.constant 0 : i32
    %c0_i32_1 = arith.constant 0 : i32
    return %c0_i32, %c0_i32_0 : i32, i32
  }
  func.func @transform_5(%arg0: i32) -> (i32, i32) {
    %c0_i32 = arith.constant 0 : i32
    %c0_i32_0 = arith.constant 0 : i32
    return %c0_i32, %arg0 : i32, i32
  }
  func.func @transform_6(%arg0: i32) -> (i32, i32) {
    %c0_i32 = arith.constant 0 : i32
    %c0_i32_0 = arith.constant 0 : i32
    %c0_i32_1 = arith.constant 0 : i32
    return %c0_i32, %c0_i32_0 : i32, i32
  }
  func.func @transform_7(%arg0: i32) -> (i32, i32) {
    %c0_i32 = arith.constant 0 : i32
    %c0_i32_0 = arith.constant 0 : i32
    return %c0_i32, %arg0 : i32, i32
  }
}

module attributes {stable_mosaic.version = 11 : i64} {
  func.func @_dual_gemm_prelu_kernel(%arg0: i32, %arg1: memref<2xf32, #tpu.memory_space<smem>>, %arg2: memref<8x8xf32, #tpu.memory_space<vmem>>, %arg3: memref<8x128xf32, #tpu.memory_space<vmem>>, %arg4: memref<8x1xf32, #tpu.memory_space<vmem>>, %arg5: memref<8x288xf32, #tpu.memory_space<vmem>>, %arg6: memref<288x128xf32, #tpu.memory_space<vmem>>, %arg7: memref<8x1xf32, #tpu.memory_space<vmem>>, %arg8: memref<8x128xf32, #tpu.memory_space<vmem>>) attributes {dimension_semantics = [#tpu.dimension_semantics<parallel>], iteration_bounds = array<i64: 1>, scalar_prefetch = 0 : i64, scratch_operands = 0 : i64, tpu.core_type = #tpu.core_type<tc>, window_params = [{transform_indices = @transform_0, window_bounds = array<i64: 2>}, {pipeline_mode = #tpu.pipeline_mode<synchronous>, transform_indices = @transform_1, window_bounds = array<i64: 8, 8>}, {transform_indices = @transform_2, window_bounds = array<i64: 8, 128>}, {pipeline_mode = #tpu.pipeline_mode<synchronous>, transform_indices = @transform_3, window_bounds = array<i64: 8, 1>}, {pipeline_mode = #tpu.pipeline_mode<synchronous>, transform_indices = @transform_4, window_bounds = array<i64: 8, 288>}, {transform_indices = @transform_5, window_bounds = array<i64: 288, 128>}, {pipeline_mode = #tpu.pipeline_mode<synchronous>, transform_indices = @transform_6, window_bounds = array<i64: 8, 1>}, {transform_indices = @transform_7, window_bounds = array<i64: 8, 128>}]} {
    %c0 = arith.constant 0 : index
    %c0_0 = arith.constant 0 : index
    %0 = vector.load %arg2[%c0, %c0_0] : memref<8x8xf32, #tpu.memory_space<vmem>>, vector<8x8xf32>
    %c0_1 = arith.constant 0 : index
    %c0_2 = arith.constant 0 : index
    %1 = vector.load %arg3[%c0_1, %c0_2] : memref<8x128xf32, #tpu.memory_space<vmem>>, vector<8x128xf32>
    %2 = vector.extract_strided_slice %0 {offsets = [0, 0], sizes = [8, 1], strides = [1, 1]} : vector<8x8xf32> to vector<8x1xf32>
    %3 = vector.extract_strided_slice %1 {offsets = [0, 0], sizes = [1, 128], strides = [1, 1]} : vector<8x128xf32> to vector<1x128xf32>
    %4 = vector.broadcast %2 : vector<8x1xf32> to vector<8x128xf32>
    %5 = vector.broadcast %3 : vector<1x128xf32> to vector<8x128xf32>
    %6 = arith.mulf %4, %5 : vector<8x128xf32>
    %7 = vector.extract_strided_slice %0 {offsets = [0, 1], sizes = [8, 1], strides = [1, 1]} : vector<8x8xf32> to vector<8x1xf32>
    %8 = vector.extract_strided_slice %1 {offsets = [1, 0], sizes = [1, 128], strides = [1, 1]} : vector<8x128xf32> to vector<1x128xf32>
    %9 = vector.broadcast %7 : vector<8x1xf32> to vector<8x128xf32>
    %10 = vector.broadcast %8 : vector<1x128xf32> to vector<8x128xf32>
    %11 = arith.mulf %9, %10 : vector<8x128xf32>
    %12 = arith.addf %6, %11 : vector<8x128xf32>
    %13 = vector.extract_strided_slice %0 {offsets = [0, 2], sizes = [8, 1], strides = [1, 1]} : vector<8x8xf32> to vector<8x1xf32>
    %14 = vector.extract_strided_slice %1 {offsets = [2, 0], sizes = [1, 128], strides = [1, 1]} : vector<8x128xf32> to vector<1x128xf32>
    %15 = vector.broadcast %13 : vector<8x1xf32> to vector<8x128xf32>
    %16 = vector.broadcast %14 : vector<1x128xf32> to vector<8x128xf32>
    %17 = arith.mulf %15, %16 : vector<8x128xf32>
    %18 = arith.addf %12, %17 : vector<8x128xf32>
    %19 = vector.extract_strided_slice %0 {offsets = [0, 3], sizes = [8, 1], strides = [1, 1]} : vector<8x8xf32> to vector<8x1xf32>
    %20 = vector.extract_strided_slice %1 {offsets = [3, 0], sizes = [1, 128], strides = [1, 1]} : vector<8x128xf32> to vector<1x128xf32>
    %21 = vector.broadcast %19 : vector<8x1xf32> to vector<8x128xf32>
    %22 = vector.broadcast %20 : vector<1x128xf32> to vector<8x128xf32>
    %23 = arith.mulf %21, %22 : vector<8x128xf32>
    %24 = arith.addf %18, %23 : vector<8x128xf32>
    %25 = vector.extract_strided_slice %0 {offsets = [0, 4], sizes = [8, 1], strides = [1, 1]} : vector<8x8xf32> to vector<8x1xf32>
    %26 = vector.extract_strided_slice %1 {offsets = [4, 0], sizes = [1, 128], strides = [1, 1]} : vector<8x128xf32> to vector<1x128xf32>
    %27 = vector.broadcast %25 : vector<8x1xf32> to vector<8x128xf32>
    %28 = vector.broadcast %26 : vector<1x128xf32> to vector<8x128xf32>
    %29 = arith.mulf %27, %28 : vector<8x128xf32>
    %30 = arith.addf %24, %29 : vector<8x128xf32>
    %31 = vector.extract_strided_slice %0 {offsets = [0, 5], sizes = [8, 1], strides = [1, 1]} : vector<8x8xf32> to vector<8x1xf32>
    %32 = vector.extract_strided_slice %1 {offsets = [5, 0], sizes = [1, 128], strides = [1, 1]} : vector<8x128xf32> to vector<1x128xf32>
    %33 = vector.broadcast %31 : vector<8x1xf32> to vector<8x128xf32>
    %34 = vector.broadcast %32 : vector<1x128xf32> to vector<8x128xf32>
    %35 = arith.mulf %33, %34 : vector<8x128xf32>
    %36 = arith.addf %30, %35 : vector<8x128xf32>
    %37 = vector.extract_strided_slice %0 {offsets = [0, 6], sizes = [8, 1], strides = [1, 1]} : vector<8x8xf32> to vector<8x1xf32>
    %38 = vector.extract_strided_slice %1 {offsets = [6, 0], sizes = [1, 128], strides = [1, 1]} : vector<8x128xf32> to vector<1x128xf32>
    %39 = vector.broadcast %37 : vector<8x1xf32> to vector<8x128xf32>
    %40 = vector.broadcast %38 : vector<1x128xf32> to vector<8x128xf32>
    %41 = arith.mulf %39, %40 : vector<8x128xf32>
    %42 = arith.addf %36, %41 : vector<8x128xf32>
    %43 = vector.extract_strided_slice %0 {offsets = [0, 7], sizes = [8, 1], strides = [1, 1]} : vector<8x8xf32> to vector<8x1xf32>
    %44 = vector.extract_strided_slice %1 {offsets = [7, 0], sizes = [1, 128], strides = [1, 1]} : vector<8x128xf32> to vector<1x128xf32>
    %45 = vector.broadcast %43 : vector<8x1xf32> to vector<8x128xf32>
    %46 = vector.broadcast %44 : vector<1x128xf32> to vector<8x128xf32>
    %47 = arith.mulf %45, %46 : vector<8x128xf32>
    %48 = arith.addf %42, %47 : vector<8x128xf32>
    %c0_3 = arith.constant 0 : index
    %c0_4 = arith.constant 0 : index
    %49 = vector.load %arg4[%c0_3, %c0_4] : memref<8x1xf32, #tpu.memory_space<vmem>>, vector<8x1xf32>
    %50 = vector.broadcast %49 : vector<8x1xf32> to vector<8x128xf32>
    %51 = arith.addf %48, %50 : vector<8x128xf32>
    %cst = arith.constant 0.000000e+00 : f32
    %52 = vector.broadcast %cst : f32 to vector<8x128xf32>
    %53 = arith.cmpf oge, %51, %52 : vector<8x128xf32>
    %c0_5 = arith.constant 0 : index
    %54 = memref.load %arg1[%c0_5] : memref<2xf32, #tpu.memory_space<smem>>
    %55 = vector.broadcast %54 : f32 to vector<8x128xf32>
    %56 = arith.mulf %55, %51 : vector<8x128xf32>
    %57 = arith.select %53, %51, %56 : vector<8x128xi1>, vector<8x128xf32>
    %c0_6 = arith.constant 0 : index
    %c0_7 = arith.constant 0 : index
    %58 = vector.load %arg5[%c0_6, %c0_7] : memref<8x288xf32, #tpu.memory_space<vmem>>, vector<8x288xf32>
    %c0_8 = arith.constant 0 : index
    %c0_9 = arith.constant 0 : index
    %59 = vector.load %arg6[%c0_8, %c0_9] : memref<288x128xf32, #tpu.memory_space<vmem>>, vector<288x128xf32>
    %cst_10 = arith.constant dense<0.000000e+00> : vector<8x128xf32>
    %60 = tpu.matmul %58, %59, %cst_10 {dimension_numbers = #tpu.dot_dimension_numbers<[1], [0], [0], [1], [0, 0, 1, 1], [], []>, precision = #tpu.contract_precision<fp32>} : vector<8x288xf32>, vector<288x128xf32>, vector<8x128xf32> -> vector<8x128xf32>
    %c0_11 = arith.constant 0 : index
    %c0_12 = arith.constant 0 : index
    %61 = vector.load %arg7[%c0_11, %c0_12] : memref<8x1xf32, #tpu.memory_space<vmem>>, vector<8x1xf32>
    %62 = vector.broadcast %61 : vector<8x1xf32> to vector<8x128xf32>
    %63 = arith.addf %60, %62 : vector<8x128xf32>
    %cst_13 = arith.constant 0.000000e+00 : f32
    %64 = vector.broadcast %cst_13 : f32 to vector<8x128xf32>
    %65 = arith.cmpf oge, %63, %64 : vector<8x128xf32>
    %c1 = arith.constant 1 : index
    %66 = memref.load %arg1[%c1] : memref<2xf32, #tpu.memory_space<smem>>
    %67 = vector.broadcast %66 : f32 to vector<8x128xf32>
    %68 = arith.mulf %67, %63 : vector<8x128xf32>
    %69 = arith.select %65, %63, %68 : vector<8x128xi1>, vector<8x128xf32>
    %70 = arith.addf %57, %69 : vector<8x128xf32>
    %c0_14 = arith.constant 0 : index
    %c0_15 = arith.constant 0 : index
    %71 = vector.load %arg8[%c0_14, %c0_15] : memref<8x128xf32, #tpu.memory_space<vmem>>, vector<8x128xf32>
    tpu.vector_store %arg8[%c0_14, %c0_15], %70 {strides = array<i32>} : memref<8x128xf32, #tpu.memory_space<vmem>>, vector<8x128xf32>,
    return
  }
  func.func @transform_0(%arg0: i32) -> i32 {
    %c0_i32 = arith.constant 0 : i32
    %c0_i32_0 = arith.constant 0 : i32
    return %c0_i32 : i32
  }
  func.func @transform_1(%arg0: i32) -> (i32, i32) {
    %c0_i32 = arith.constant 0 : i32
    %c0_i32_0 = arith.constant 0 : i32
    %c0_i32_1 = arith.constant 0 : i32
    return %c0_i32, %c0_i32_0 : i32, i32
  }
  func.func @transform_2(%arg0: i32) -> (i32, i32) {
    %c0_i32 = arith.constant 0 : i32
    %c0_i32_0 = arith.constant 0 : i32
    return %c0_i32, %arg0 : i32, i32
  }
  func.func @transform_3(%arg0: i32) -> (i32, i32) {
    %c0_i32 = arith.constant 0 : i32
    %c0_i32_0 = arith.constant 0 : i32
    %c0_i32_1 = arith.constant 0 : i32
    return %c0_i32, %c0_i32_0 : i32, i32
  }
  func.func @transform_4(%arg0: i32) -> (i32, i32) {
    %c0_i32 = arith.constant 0 : i32
    %c0_i32_0 = arith.constant 0 : i32
    %c0_i32_1 = arith.constant 0 : i32
    return %c0_i32, %c0_i32_0 : i32, i32
  }
  func.func @transform_5(%arg0: i32) -> (i32, i32) {
    %c0_i32 = arith.constant 0 : i32
    %c0_i32_0 = arith.constant 0 : i32
    return %c0_i32, %arg0 : i32, i32
  }
  func.func @transform_6(%arg0: i32) -> (i32, i32) {
    %c0_i32 = arith.constant 0 : i32
    %c0_i32_0 = arith.constant 0 : i32
    %c0_i32_1 = arith.constant 0 : i32
    return %c0_i32, %c0_i32_0 : i32, i32
  }
  func.func @transform_7(%arg0: i32) -> (i32, i32) {
    %c0_i32 = arith.constant 0 : i32
    %c0_i32_0 = arith.constant 0 : i32
    return %c0_i32, %arg0 : i32, i32
  }
}

</mosaic_0001>

<bundles_post_ra>
// kernel: _lambda_.3
= control target key start
LH: loop header
LB: loop body
LE: loop exit
PB: predicated region body
PF: predicated region fallthrough
CT: control target
= control target key end

     0   :  { %v913_v0 = vmov 0.0|0.0   ;;  %v914_v8 = vmov 0   ;;  %vm44_vm0 = vcmask 130048   ;;  %s1356_s2 = inlined_call_operand.vmem [shape: f32[144,128], index: 2, kind: input, shape index: {}]   ;;  %s1357_s1 = inlined_call_operand.vmem [shape: f32[8,144], index: 1, kind: input, shape index: {}]   ;;  %s1358_s3 = inlined_call_operand.vmem [shape: f32[8,1], index: 3, kind: input, shape index: {}]   ;;  %s1359_s0 = inlined_call_operand.<no memory space> [shape: f32[1], index: 0, kind: input, shape index: {}]   ;;  %s1360_s4 = inlined_call_operand.vmem [shape: f32[8,128], index: 4, kind: output, shape index: {}]  }
   0x1   :  { %738 = vmatprep.subr.bf16.mxu1 %v913_v0  ;;  %819 = vmatprep.subr.bf16.mxu0 %v913_v0  ;;  %v945_v1 = vld [vmem:[%s1356_s2] sm:$0xff]  ;;  %v950_v2 = vld [vmem:[%s1356_s2 + $0x8] sm:$0xff]  ;;  %v955_v3 = vld [vmem:[%s1356_s2 + $0x10] sm:$0xff] }
   0x2   :  { %v49_v4 = vand.u32 4294901760, %v945_v1  ;;  %v52_v5 = vand.u32 4294901760, %v950_v2  ;;  %v962_v6 = vld [vmem:[%s1356_s2 + $0x18] sm:$0xff]  ;;  %v55_v7 = vand.u32 4294901760, %v955_v3  ;;  %912 = vset.pattern.permute.xlu0 %v914_v8  ;;  %v969_v10 = vld [vmem:[%s1356_s2 + $0x20] sm:$0xff]  ;;  %v974_v11 = vld [vmem:[%s1356_s2 + $0x28] sm:$0xff] }
   0x3   :  { %v58_v9 = vand.u32 4294901760, %v962_v6  ;;  %v61_v14 = vand.u32 4294901760, %v969_v10  ;;  %v64_v15 = vand.u32 4294901760, %v974_v11  ;;  %v993_v16 = vld [vmem:[%s1356_s2 + $0x30] sm:$0xff]  ;;  %v998_v17 = vld [vmem:[%s1356_s2 + $0x38] sm:$0xff]  ;;  %v19_v18 = vld [vmem:[%s1357_s1 + $0x8] sm:$0xff] }
   0x4   :  { %v976_v12 = vpack.c.bf16 %v52_v5, %v49_v4  ;;  %v38_v19 = vld [vmem:[%s1358_s3] sm:$0xff]  ;;  %v67_v21 = vand.u32 4294901760, %v993_v16  ;;  %v70_v22 = vand.u32 4294901760, %v998_v17  ;;  %v1026_v24 = vld [vmem:[%s1356_s2 + $0x48] sm:$0xff]  ;;  %v46_v25 = vsel %vm44_vm0, %v19_v18, 0  ;;  %v1048_v31 = vld [vmem:[%s1356_s2 + $0x50] sm:$0xff] }
   0x5   :  { %v984_v13 = vpack.c.bf16 %v58_v9, %v55_v7  ;;  %41 = vperm.xlu0 %912, %v38_v19   ;;  %v1012_v20 = vpack.c.bf16 %v64_v15, %v61_v14  ;;  %v1021_v23 = vld [vmem:[%s1356_s2 + $0x40] sm:$0xff]  ;;  %v1028_v26 = vand.u32 4294901760, %v46_v25  ;;  %v76_v29 = vand.u32 4294901760, %v1026_v24  ;;  %v1053_v32 = vld [vmem:[%s1356_s2 + $0x58] sm:$0xff]  ;;  %v1080_v40 = vld [vmem:[%s1356_s2 + $0x68] sm:$0xff] }
   0x6   :  { %740 = vmatpush1.bf16.msra.mxu1 %v976_v12  ;;  %821 = vmatpush1.bf16.msra.mxu0 %v976_v12  ;;  %v1036_v27 = vpack.c.bf16 %v70_v22, %v67_v21  ;;  %v73_v28 = vand.u32 4294901760, %v1021_v23  ;;  %v79_v35 = vand.u32 4294901760, %v1048_v31  ;;  %v82_v36 = vand.u32 4294901760, %v1053_v32  ;;  %v18_v37 = vld [vmem:[%s1357_s1] sm:$0xff]  ;;  %v1103_v48 = vld [vmem:[%s1356_s2 + $0x70] sm:$0xff]  ;;  %v1110_v49 = vld [vmem:[%s1356_s2 + $0x78] sm:$0xff] }
   0x7   :  { %741 = vmatprep.subr.bf16.mxu1 %v913_v0  ;;  %822 = vmatprep.subr.bf16.mxu0 %v913_v0  ;;  %v1041_v30 = vsub.f32 %v46_v25, %v1028_v26  ;;  %v1075_v39 = vld [vmem:[%s1356_s2 + $0x60] sm:$0xff]  ;;  %v1083_v42 = vsub.f32 %v945_v1, %v49_v4  ;;  %v1085_v43 = vand.u32 4294901760, %v18_v37  ;;  %v1088_v44 = vsub.f32 %v950_v2, %v52_v5  ;;  %v1147_v59 = vld [vmem:[%s1356_s2 + $0x88] sm:$0xff] }
   0x8   :  { %v1062_v34 = vpack.c.bf16 %v76_v29, %v73_v28  ;;  %v1096_v45 = vpack.c.bf16 %v82_v36, %v79_v35  ;;  %v85_v46 = vand.u32 4294901760, %v1075_v39  ;;  %v88_v47 = vand.u32 4294901760, %v1080_v40  ;;  %v1138_v56 = vld [vmem:[%s1356_s2 + $0x80] sm:$0xff] }
   0x9   :  { %v132_v33 = vand.u32 4294901760, %v1041_v30  ;;  %v1115_v50 = vsub.f32 %v955_v3, %v55_v7  ;;  %v1120_v51 = vsub.f32 %v962_v6, %v58_v9  ;;  %v91_v52 = vand.u32 4294901760, %v1103_v48 }
   0xa   :  { %743 = vmatpush1.bf16.msra.mxu1 %v984_v13  ;;  %824 = vmatpush1.bf16.msra.mxu0 %v984_v13  ;;  %v1124_v53 = vsub.f32 %v18_v37, %v1085_v43  ;;  %v1132_v54 = vpack.c.bf16 %v88_v47, %v85_v46  ;;  %v94_v55 = vand.u32 4294901760, %v1110_v49  ;;  %v149_v57 = vand.u32 4294901760, %v1083_v42 }
   0xb   :  { %744 = vmatprep.subr.bf16.mxu1 %v913_v0  ;;  %825 = vmatprep.subr.bf16.mxu0 %v913_v0  ;;  %v133_v38 = vsub.f32 %v1041_v30, %v132_v33  ;;  %v156_v58 = vand.u32 4294901760, %v1088_v44  ;;  %v1152_v60 = vsub.f32 %v969_v10, %v61_v14  ;;  %v1157_v61 = vsub.f32 %v974_v11, %v64_v15 }
   0xc   :  { %503 = vmatprep.mubr.f32.mxu0 %v132_v33  ;;  %v97_v62 = vand.u32 4294901760, %v1138_v56  ;;  %v138_v63 = vand.u32 4294901760, %v1124_v53  ;;  %v163_v1 = vand.u32 4294901760, %v1115_v50  ;;  %v170_v2 = vand.u32 4294901760, %v1120_v51 }
   0xd   :  { %v134_v41 = vand.u32 4294901760, %v133_v38  ;;  %v1169_v3 = vpack.c.bf16 %v94_v55, %v91_v52  ;;  %v100_v4 = vand.u32 4294901760, %v1147_v59  ;;  %v150_v5 = vsub.f32 %v1083_v42, %v149_v57 }
   0xe   :  { %746 = vmatpush1.bf16.msra.mxu1 %v1012_v20  ;;  %827 = vmatpush1.bf16.msra.mxu0 %v1012_v20  ;;  %v157_v6 = vsub.f32 %v1088_v44, %v156_v58  ;;  %v1179_v7 = vsub.f32 %v993_v16, %v67_v21  ;;  %v1184_v8 = vsub.f32 %v998_v17, %v70_v22  ;;  %v177_v14 = vand.u32 4294901760, %v1152_v60 }
   0xf   :  { %747 = vmatprep.subr.bf16.mxu1 %v913_v0  ;;  %828 = vmatprep.subr.bf16.mxu0 %v913_v0  ;;  %v139_v9 = vsub.f32 %v1124_v53, %v138_v63  ;;  %v164_v10 = vsub.f32 %v1115_v50, %v163_v1  ;;  %v171_v11 = vsub.f32 %v1120_v51, %v170_v2  ;;  %v151_v16 = vand.u32 4294901760, %v150_v5 }
  0x10   :  { %135 = vmatprep.mubr.f32.mxu1 %v134_v41  ;;  %v1196_v15 = vpack.c.bf16 %v100_v4, %v97_v62  ;;  %v158_v17 = vand.u32 4294901760, %v157_v6  ;;  %v184_v18 = vand.u32 4294901760, %v1157_v61  ;;  %v1204_v19 = vsub.f32 %v1021_v23, %v73_v28 }
  0x11   :  { %v1209_v21 = vsub.f32 %v1026_v24, %v76_v29  ;;  %v847_v22 = vpack.c.bf16 %v156_v58, %v149_v57  ;;  %v140_v25 = vand.u32 4294901760, %v139_v9  ;;  %v165_v33 = vand.u32 4294901760, %v164_v10 }
  0x12   :  { %749 = vmatpush1.bf16.msra.mxu1 %v1036_v27  ;;  %830 = vmatpush1.bf16.msra.mxu0 %v1036_v27  ;;  %v172_v37 = vand.u32 4294901760, %v171_v11  ;;  %v178_v38 = vsub.f32 %v1152_v60, %v177_v14  ;;  %v766_v41 = vpack.c.bf16 %v158_v17, %v151_v16  ;;  %v185_v5 = vsub.f32 %v1157_v61, %v184_v18 }
  0x13   :  { %750 = vmatprep.subr.bf16.mxu1 %v913_v0  ;;  %831 = vmatprep.subr.bf16.mxu0 %v913_v0  ;;  %v191_v23 = vand.u32 4294901760, %v1179_v7  ;;  %v198_v28 = vand.u32 4294901760, %v1184_v8  ;;  %v1222_v24 = vsub.f32 %v1048_v31, %v79_v35  ;;  %v1227_v29 = vsub.f32 %v1053_v32, %v82_v36 }
  0x14   :  { %v769_v57 = vpack.c.bf16 %v172_v37, %v165_v33  ;;  %v850_v58 = vpack.c.bf16 %v170_v2, %v163_v1  ;;  %v179_v6 = vand.u32 4294901760, %v178_v38  ;;  %v205_v9 = vand.u32 4294901760, %v1204_v19 }
  0x15   :  { %v186_v10 = vand.u32 4294901760, %v185_v5  ;;  %v192_v11 = vsub.f32 %v1179_v7, %v191_v23  ;;  %v199_v31 = vsub.f32 %v1184_v8, %v198_v28  ;;  %v212_v35 = vand.u32 4294901760, %v1209_v21 }
  0x16   :  { %752 = vmatpush1.bf16.msra.mxu1 %v1062_v34  ;;  %833 = vmatpush1.bf16.msra.mxu0 %v1062_v34  ;;  %v1238_v32 = vsub.f32 %v1075_v39, %v85_v46  ;;  %v1243_v36 = vsub.f32 %v1080_v40, %v88_v47  ;;  %v206_v1 = vsub.f32 %v1204_v19, %v205_v9  ;;  %v219_v2 = vand.u32 4294901760, %v1222_v24 }
  0x17   :  { %753 = vmatprep.subr.bf16.mxu1 %v913_v0  ;;  %834 = vmatprep.subr.bf16.mxu0 %v913_v0  ;;  %v226_v16 = vand.u32 4294901760, %v1227_v29  ;;  %v772_v39 = vpack.c.bf16 %v186_v10, %v179_v6  ;;  %v193_v46 = vand.u32 4294901760, %v192_v11  ;;  %v200_v17 = vand.u32 4294901760, %v199_v31 }
  0x18   :  { %v1256_v40 = vsub.f32 %v1103_v48, %v91_v52  ;;  %v1261_v47 = vsub.f32 %v1110_v49, %v94_v55  ;;  %v240_v48 = vand.u32 4294901760, %v1243_v36  ;;  %v1272_v49 = vsub.f32 %v1138_v56, %v97_v62 }
  0x19   :  { %v227_v33 = vsub.f32 %v1227_v29, %v226_v16  ;;  %v775_v37 = vpack.c.bf16 %v200_v17, %v193_v46  ;;  %v1277_v52 = vsub.f32 %v1147_v59, %v100_v4  ;;  %v859_v55 = vpack.c.bf16 %v212_v35, %v205_v9 }
  0x1a   :  { %755 = vmatpush1.bf16.msra.mxu1 %v1096_v45  ;;  %836 = vmatpush1.bf16.msra.mxu0 %v1096_v45  ;;  %v241_v56 = vsub.f32 %v1243_v36, %v240_v48  ;;  %v862_v62 = vpack.c.bf16 %v226_v16, %v219_v2  ;;  %v261_v31 = vand.u32 4294901760, %v1272_v49 }
  0x1b   :  { %756 = vmatprep.subr.bf16.mxu1 %v913_v0  ;;  %837 = vmatprep.subr.bf16.mxu0 %v913_v0 }
  0x1c   :  { %v242_v11 = vand.u32 4294901760, %v241_v56 }
  0x1e   :  { %758 = vmatpush1.bf16.msra.mxu1 %v1132_v54  ;;  %839 = vmatpush1.bf16.msra.mxu0 %v1132_v54 }
  0x1f   :  { %759 = vmatprep.subr.bf16.mxu1 %v913_v0  ;;  %840 = vmatprep.subr.bf16.mxu0 %v913_v0 }
  0x22   :  { %761 = vmatpush1.bf16.msra.mxu1 %v1169_v3  ;;  %842 = vmatpush1.bf16.msra.mxu0 %v1169_v3 }
  0x23   :  { %762 = vmatprep.subr.bf16.mxu1 %v913_v0  ;;  %843 = vmatprep.subr.bf16.mxu0 %v913_v0 }
  0x26   :  { %764 = vmatpush1.bf16.msra.mxu1 %v1196_v15  ;;  %845 = vmatpush1.bf16.msra.mxu0 %v1196_v15 }
  0x27   :  { %765 = vmatprep.subr.bf16.mxu1 %v913_v0  ;;  %846 = vmatprep.subr.bf16.mxu0 %v913_v0 }
  0x29   :  { %141 = vmatmul.mubr.f32.vlgmr.msra.gmra.mrb[0].mxu1 %v140_v25  ;;  %507 = vmatmul.mubr.f32.vlgmr.msra.gmra.mrb[0].mxu0 %v138_v63  ;;  %v853_v63 = vpack.c.bf16 %v184_v18, %v177_v14  ;;  %v856_v14 = vpack.c.bf16 %v198_v28, %v191_v23  ;;  %v207_v18 = vand.u32 4294901760, %v206_v1  ;;  %v220_v25 = vsub.f32 %v1222_v24, %v219_v2 }
  0x2a   :  { %767 = vmatpush1.bf16.msra.mxu1 %v766_v41  ;;  %848 = vmatpush1.bf16.msra.mxu0 %v847_v22  ;;  %v213_v22 = vsub.f32 %v1209_v21, %v212_v35  ;;  %v233_v41 = vand.u32 4294901760, %v1238_v32  ;;  %v228_v23 = vand.u32 4294901760, %v227_v33  ;;  %v247_v28 = vand.u32 4294901760, %v1256_v40 }
  0x2b   :  { %768 = vmatprep.subr.bf16.mxu1 %v913_v0  ;;  %849 = vmatprep.subr.bf16.mxu0 %v913_v0  ;;  %v221_v5 = vand.u32 4294901760, %v220_v25  ;;  %v268_v35 = vand.u32 4294901760, %v1277_v52 }
  0x2c   :  { %301 = vmatprep.mubr.f32.mxu1 %v1028_v26  ;;  %631 = vmatprep.mubr.f32.mxu0 %v1028_v26  ;;  %v214_v38 = vand.u32 4294901760, %v213_v22  ;;  %v234_v6 = vsub.f32 %v1238_v32, %v233_v41  ;;  %v248_v4 = vsub.f32 %v1256_v40, %v247_v28 }
  0x2d   :  { %v781_v59 = vpack.c.bf16 %v228_v23, %v221_v5  ;;  %v269_v46 = vsub.f32 %v1277_v52, %v268_v35  ;;  %v871_v33 = vpack.c.bf16 %v268_v35, %v261_v31 }
  0x2e   :  { %770 = vmatpush1.bf16.msra.mxu1 %v769_v57  ;;  %851 = vmatpush1.bf16.msra.mxu0 %v850_v58  ;;  %v254_v57 = vand.u32 4294901760, %v1261_v47  ;;  %v778_v58 = vpack.c.bf16 %v214_v38, %v207_v18  ;;  %v235_v10 = vand.u32 4294901760, %v234_v6  ;;  %v249_v1 = vand.u32 4294901760, %v248_v4 }
  0x2f   :  { %771 = vmatprep.subr.bf16.mxu1 %v913_v0  ;;  %852 = vmatprep.subr.bf16.mxu0 %v913_v0  ;;  %v270_v18 = vand.u32 4294901760, %v269_v46  ;;  %v796_v38 = vpack.c.bf16 %v1120_v51, %v1115_v50 }
  0x30   :  { %v255_v9 = vsub.f32 %v1261_v47, %v254_v57  ;;  %v784_v2 = vpack.c.bf16 %v242_v11, %v235_v10  ;;  %v868_v22 = vpack.c.bf16 %v254_v57, %v247_v28 }
  0x32   :  { %773 = vmatpush1.bf16.msra.mxu1 %v772_v39  ;;  %854 = vmatpush1.bf16.msra.mxu0 %v853_v63  ;;  %v865_v63 = vpack.c.bf16 %v240_v48, %v233_v41  ;;  %v256_v16 = vand.u32 4294901760, %v255_v9  ;;  %v262_v39 = vsub.f32 %v1272_v49, %v261_v31 }
  0x33   :  { %774 = vmatprep.subr.bf16.mxu1 %v913_v0  ;;  %855 = vmatprep.subr.bf16.mxu0 %v913_v0 }
  0x34   :  { %v787_v17 = vpack.c.bf16 %v256_v16, %v249_v1 }
  0x36   :  { %776 = vmatpush1.bf16.msra.mxu1 %v775_v37  ;;  %857 = vmatpush1.bf16.msra.mxu0 %v856_v14  ;;  %v263_v14 = vand.u32 4294901760, %v262_v39  ;;  %v793_v37 = vpack.c.bf16 %v1088_v44, %v1083_v42  ;;  %v799_v42 = vpack.c.bf16 %v1157_v61, %v1152_v60  ;;  %v730_v60 = vstv %s1359_s0 }
  0x37   :  { %777 = vmatprep.subr.bf16.mxu1 %v913_v0  ;;  %858 = vmatprep.subr.bf16.mxu0 %v913_v0 }
  0x38   :  { %v790_v25 = vpack.c.bf16 %v270_v18, %v263_v14 }
  0x3a   :  { %779 = vmatpush1.bf16.msra.mxu1 %v778_v58  ;;  %860 = vmatpush1.bf16.msra.mxu0 %v859_v55 }
  0x3b   :  { %780 = vmatprep.subr.bf16.mxu1 %v913_v0  ;;  %861 = vmatprep.subr.bf16.mxu0 %v913_v0 }
  0x3e   :  { %782 = vmatpush1.bf16.msra.mxu1 %v781_v59  ;;  %863 = vmatpush1.bf16.msra.mxu0 %v862_v62 }
  0x3f   :  { %783 = vmatprep.subr.bf16.mxu1 %v913_v0  ;;  %864 = vmatprep.subr.bf16.mxu0 %v913_v0 }
  0x42   :  { %785 = vmatpush1.bf16.msra.mxu1 %v784_v2  ;;  %866 = vmatpush1.bf16.msra.mxu0 %v865_v63 }
  0x43   :  { %786 = vmatprep.subr.bf16.mxu1 %v913_v0  ;;  %867 = vmatprep.subr.bf16.mxu0 %v913_v0 }
  0x46   :  { %788 = vmatpush1.bf16.msra.mxu1 %v787_v17  ;;  %869 = vmatpush1.bf16.msra.mxu0 %v868_v22 }
  0x47   :  { %789 = vmatprep.subr.bf16.mxu1 %v913_v0  ;;  %870 = vmatprep.subr.bf16.mxu0 %v913_v0 }
  0x4a   :  { %791 = vmatpush1.bf16.msra.mxu1 %v790_v25  ;;  %872 = vmatpush1.bf16.msra.mxu0 %v871_v33 }
  0x4b   :  { %792 = vmatprep.subr.bf16.mxu1 %v913_v0  ;;  %873 = vmatprep.subr.bf16.mxu0 %v913_v0 }
  0x4d   :  { %303 = vmatmul.mubr.f32.vlgmr.msra.gmra.mrb[0].mxu1 %v1085_v43  ;;  %633 = vmatmul.mubr.f32.vlgmr.msra.gmra.mrb[0].mxu0 %v1085_v43 }
  0x4e   :  { %794 = vmatpush1.bf16.msra.mxu1 %v793_v37  ;;  %875 = vmatpush1.bf16.msra.mxu0 %v976_v12  ;;  %v802_v12 = vpack.c.bf16 %v1184_v8, %v1179_v7 }
  0x4f   :  { %795 = vmatprep.subr.bf16.mxu1 %v913_v0  ;;  %876 = vmatprep.subr.bf16.mxu0 %v913_v0 }
  0x50   :  { %410 = vmatprep.mubr.f32.mxu1 %v1041_v30  ;;  %721 = vmatprep.mubr.f32.mxu0 %v1028_v26  ;;  %v811_v26 = vpack.c.bf16 %v1243_v36, %v1238_v32  ;;  %v817_v30 = vpack.c.bf16 %v1277_v52, %v1272_v49 }
  0x52   :  { %797 = vmatpush1.bf16.msra.mxu1 %v796_v38  ;;  %878 = vmatpush1.bf16.msra.mxu0 %v984_v13  ;;  %v805_v13 = vpack.c.bf16 %v1209_v21, %v1204_v19 }
  0x53   :  { %798 = vmatprep.subr.bf16.mxu1 %v913_v0  ;;  %879 = vmatprep.subr.bf16.mxu0 %v913_v0 }
  0x56   :  { %800 = vmatpush1.bf16.msra.mxu1 %v799_v42  ;;  %881 = vmatpush1.bf16.msra.mxu0 %v1012_v20  ;;  %v808_v20 = vpack.c.bf16 %v1227_v29, %v1222_v24 }
  0x57   :  { %801 = vmatprep.subr.bf16.mxu1 %v913_v0  ;;  %882 = vmatprep.subr.bf16.mxu0 %v913_v0 }
  0x5a   :  { %803 = vmatpush1.bf16.msra.mxu1 %v802_v12  ;;  %884 = vmatpush1.bf16.msra.mxu0 %v1036_v27  ;;  %v814_v27 = vpack.c.bf16 %v1261_v47, %v1256_v40 }
  0x5b   :  { %804 = vmatprep.subr.bf16.mxu1 %v913_v0  ;;  %885 = vmatprep.subr.bf16.mxu0 %v913_v0 }
  0x5e   :  { %806 = vmatpush1.bf16.msra.mxu1 %v805_v13  ;;  %887 = vmatpush1.bf16.msra.mxu0 %v1062_v34 }
  0x5f   :  { %807 = vmatprep.subr.bf16.mxu1 %v913_v0  ;;  %888 = vmatprep.subr.bf16.mxu0 %v913_v0 }
  0x62   :  { %809 = vmatpush1.bf16.msra.mxu1 %v808_v20  ;;  %890 = vmatpush1.bf16.msra.mxu0 %v1096_v45 }
  0x63   :  { %810 = vmatprep.subr.bf16.mxu1 %v913_v0  ;;  %891 = vmatprep.subr.bf16.mxu0 %v913_v0 }
  0x66   :  { %812 = vmatpush1.bf16.msra.mxu1 %v811_v26  ;;  %893 = vmatpush1.bf16.msra.mxu0 %v1132_v54 }
  0x67   :  { %813 = vmatprep.subr.bf16.mxu1 %v913_v0  ;;  %894 = vmatprep.subr.bf16.mxu0 %v913_v0 }
  0x6a   :  { %815 = vmatpush1.bf16.msra.mxu1 %v814_v27  ;;  %896 = vmatpush1.bf16.msra.mxu0 %v1169_v3 }
  0x6b   :  { %816 = vmatprep.subr.bf16.mxu1 %v913_v0  ;;  %897 = vmatprep.subr.bf16.mxu0 %v913_v0 }
  0x6e   :  { %818 = vmatpush1.bf16.msra.mxu1 %v817_v30  ;;  %899 = vmatpush1.bf16.msra.mxu0 %v1196_v15 }
  0x71   :  { %413 = vmatmul.mubr.f32.vlgmr.msra.gmra.mrb[0].mxu1 %v1124_v53  ;;  %723 = vmatmul.mubr.f32.vlgmr.msra.gmra.mrb[0].mxu0 %v1085_v43 }
  0x84   :  { %v42_v34 = vpop.permute.xlu0 %41 }
 0x144   :  { %v414_v44 = vpop.f32.mrb[0].mxu1  ;;  %v724_v45 = vpop.f32.mrb[0].mxu0 }
 0x145   :  { %v900_v50 = vadd.f32 %v414_v44, %v42_v34  ;;  %v416_v51 = vpop.f32.mrb[1].mxu1  ;;  %v726_v54 = vpop.f32.mrb[1].mxu0 }
 0x147   :  { %v901_v61 = vadd.f32 %v900_v50, %v724_v45 }
 0x149   :  { %vm728_vm1 = vcmp.ge.f32.partialorder %v901_v61, 0.0  ;;  %v731_v0 = vmul.f32 %v901_v61, %v730_v60 }
 0x14b   :  { %v732_v3 = vsel %vm728_vm1, %v901_v61, %v731_v0 }
 0x14c   :  { %733 = vst [vmem:[%s1360_s4] sm:$0xff] %v732_v3 }

// kernel: tile.13
= control target key start
LH: loop header
LB: loop body
LE: loop exit
PB: predicated region body
PF: predicated region fallthrough
CT: control target
= control target key end

     0   :  { %s22_s0 = inlined_call_operand.vmem [shape: f32[8], index: 0, kind: input, shape index: {}]   ;;  %s23_s1 = inlined_call_operand.vmem [shape: f32[4,8], index: 1, kind: output, shape index: {}]  }
   0x1   :  { %v4_v0 = vld [vmem:[%s22_s0] ss:$0 sm:$0xff] }
   0x2   :  { %5 = vst [vmem:[%s23_s1] sm:$0xf] %v4_v0 }

// kernel: tile.0
= control target key start
LH: loop header
LB: loop body
LE: loop exit
PB: predicated region body
PF: predicated region fallthrough
CT: control target
= control target key end

     0   :  { %s66_s8 = smov 125   ;;  %vm7_vm0 = vcmask 7168   ;;  %s67_s11 = smov 126   ;;  %s117_s0 = inlined_call_operand.vmem [shape: f32[4,8], index: 0, kind: input, shape index: {}]   ;;  %s118_s1 = inlined_call_operand.vmem [shape: f32[32,1], index: 1, kind: output, shape index: {}]  }
   0x1   :  { %v4_v0 = vld [vmem:[%s117_s0] sm:$0xf]  ;;  %s65_s0 = smov 127   ;;  %s68_s12 = smov 124  }
   0x2   :  { %5 = vst [vmem:[#allocation0] sm:$0xf] %v4_v0  ;;  %s69_s13 = smov 123   ;;  %s70_s14 = smov 122  }
   0x3   :  { %s71_s15 = smov 121  }
   0x9   :  { %v9_v1 = vld [vmem:[#allocation0] sm:$0xf]  }
   0xa   :  { %v21_v2 = vld [vmem:[#allocation0] sm:$0xf]   ;;  %10 = vrot.lane.b32.xlu0 %v9_v1, %s65_s0 }
   0xb   :  { %22 = vrot.lane.b32.xlu1 %v21_v2, %s66_s8  ;;  %v15_v3 = vld [vmem:[#allocation0] sm:$0xf]  }
   0xc   :  { %v27_v4 = vld [vmem:[#allocation0] sm:$0xf]  }
   0xd   :  { %v6_v5 = vld [vmem:[#allocation0] sm:$0xf]  }
   0xe   :  { %8 = vst.msk [vmem:[%s118_s1] ss:$8 sm:$0xf] %vm7_vm0, %v6_v5   ;;  %16 = vrot.lane.b32.xlu0 %v15_v3, %s67_s11  ;;  %v33_v6 = vld [vmem:[#allocation0] sm:$0xf]  }
   0xf   :  { %28 = vrot.lane.b32.xlu1 %v27_v4, %s68_s12  ;;  %v39_v7 = vld [vmem:[#allocation0] sm:$0xf]  }
  0x10   :  { %v45_v8 = vld [vmem:[#allocation0] sm:$0xf]  }
  0x12   :  { %34 = vrot.lane.b32.xlu0 %v33_v6, %s69_s13 }
  0x13   :  { %40 = vrot.lane.b32.xlu1 %v39_v7, %s70_s14 }
  0x16   :  { %46 = vrot.lane.b32.xlu0 %v45_v8, %s71_s15 }
  0x7c   :  { %v11_v9 = vpop.permute.xlu0 %10  }
  0x7d   :  { %v23_v10 = vpop.permute.xlu1 %22   ;;  %51 = vst.msk [vmem:[%s118_s1 + $0x1] ss:$8 sm:$0xf] %vm7_vm0, %v11_v9  }
  0x7e   :  { %53 = vst.msk [vmem:[%s118_s1 + $0x3] ss:$8 sm:$0xf] %vm7_vm0, %v23_v10  }
  0x80   :  { %v17_v11 = vpop.permute.xlu0 %16  }
  0x81   :  { %v29_v12 = vpop.permute.xlu1 %28   ;;  %52 = vst.msk [vmem:[%s118_s1 + $0x2] ss:$8 sm:$0xf] %vm7_vm0, %v17_v11  }
  0x82   :  { %54 = vst.msk [vmem:[%s118_s1 + $0x4] ss:$8 sm:$0xf] %vm7_vm0, %v29_v12  }
  0x84   :  { %v35_v13 = vpop.permute.xlu0 %34  }
  0x85   :  { %v41_v14 = vpop.permute.xlu1 %40   ;;  %55 = vst.msk [vmem:[%s118_s1 + $0x5] ss:$8 sm:$0xf] %vm7_vm0, %v35_v13  }
  0x86   :  { %56 = vst.msk [vmem:[%s118_s1 + $0x6] ss:$8 sm:$0xf] %vm7_vm0, %v41_v14  }
  0x88   :  { %v47_v15 = vpop.permute.xlu0 %46  }
  0x89   :  { %57 = vst.msk [vmem:[%s118_s1 + $0x7] ss:$8 sm:$0xf] %vm7_vm0, %v47_v15  }

// kernel: _lambda_.4
= control target key start
LH: loop header
LB: loop body
LE: loop exit
PB: predicated region body
PF: predicated region fallthrough
CT: control target
= control target key end

     0   :  { %12 = vsyncpa [#allocation3], 0  ;;  %s2232_s0 = inlined_call_operand.vmem [shape: f32[2], index: 0, kind: input, shape index: {}]   ;;  %s2233_s1 = inlined_call_operand.vmem [shape: f32[32,16], index: 1, kind: input, shape index: {}]   ;;  %s2234_s2 = inlined_call_operand.vmem [shape: f32[16,128], index: 2, kind: input, shape index: {}]   ;;  %s2235_s3 = inlined_call_operand.vmem [shape: f32[32,1], index: 3, kind: input, shape index: {}]   ;;  %s2236_s4 = inlined_call_operand.vmem [shape: f32[32,72], index: 4, kind: input, shape index: {}]   ;;  %s2237_s5 = inlined_call_operand.vmem [shape: f32[72,128], index: 5, kind: input, shape index: {}]   ;;  %s2238_s6 = inlined_call_operand.vmem [shape: f32[32,1], index: 6, kind: input, shape index: {}]   ;;  %s2239_s7 = inlined_call_operand.vmem [shape: f32[32,128], index: 7, kind: output, shape index: {}]  }
   0x1   :  { %s19_s26 = sshll.u32 %s2232_s0, 4  ;;  %s20_s26 = int_to_ptr.vmem [resolvable:$true] %s19_s26 }
   0x2   :  { %s1685_s27 = scalar_lea.vmem %s20_s26, 16  ;;  %p1690_p1 = scmp.lt.s32.totalorder %s20_s26, %s20_s26 }
   0x3   :  { %p1686_p0 = scmp.ne.s32.totalorder %s20_s26, %s1685_s27  ;;  %p1691_p2 = scmp.lt.s32.totalorder %s1685_s27, %s1685_s27 }
   0x5   :  { %p1692_p3 = por %p1691_p2, %p1690_p1 }
   0x7   :  { %p1693_p4 = pnand %p1692_p3, %p1686_p0 }
   0x9   :  { %1696 = shalt.err (!%p1693_p4)
}
   0xa   :  { %s1699_s28 = smov [#allocation2]  }
   0xb   :  { %22 = dma.vmem_to_smem %s20_s26, 16, %s1699_s28, [#allocation3]  }
   0xc   :  { %1697 = dma.done.wait [#allocation3], 16  }
   0xd   :  { %1698 = vsyncadd [#allocation3], 4294967280 }
   0xe   :  { %38 = sfence }
   0xf   :  { %v1762_v0 = vld [vmem:[%s2233_s1 + $0x10] sm:$0xff]  ;;  %v1767_v1 = vld [vmem:[%s2233_s1] sm:$0xff]  ;;  %v1700_v2 = vmov 0   ;;  %v540_v4 = vld [vmem:[%s2237_s5 + $0x8] sm:$0xff]  ;;  %vm572_vm0 = vcmask 588800   ;;  %v1701_v35 = vmov 1  }
  0x10   :  { %1652 = vset.pattern.permute.xlu1 %v1700_v2  ;;  %1651 = vset.pattern.permute.xlu0 %v1700_v2  ;;  %v539_v3 = vld [vmem:[%s2237_s5] sm:$0xff]  ;;  %v589_v6 = vand.u32 4294901760, %v540_v4  ;;  %v541_v7 = vld [vmem:[%s2237_s5 + $0x10] sm:$0xff]  ;;  %v542_v8 = vld [vmem:[%s2237_s5 + $0x18] sm:$0xff]  ;;  %s1291_s29 = sld [smem:[#allocation2 + $0x1]] }
  0x11   :  { %57 = vperm.xlu1 %1652, %v1762_v0   ;;  %47 = vperm.xlu0 %1651, %v1767_v1   ;;  %v586_v5 = vand.u32 4294901760, %v539_v3  ;;  %v543_v9 = vld [vmem:[%s2237_s5 + $0x20] sm:$0xff]  ;;  %v1791_v10 = vld [vmem:[%s2233_s1 + $0x18] sm:$0xff]  ;;  %v1796_v11 = vld [vmem:[%s2233_s1 + $0x8] sm:$0xff]  ;;  %v592_v12 = vand.u32 4294901760, %v541_v7  ;;  %v595_v13 = vand.u32 4294901760, %v542_v8 }
  0x12   :  { %v544_v14 = vld [vmem:[%s2237_s5 + $0x28] sm:$0xff]  ;;  %v535_v16 = vld [vmem:[%s2236_s4] sm:$0xff]  ;;  %v598_v19 = vand.u32 4294901760, %v543_v9  ;;  %v545_v21 = vld [vmem:[%s2237_s5 + $0x30] sm:$0xff]  ;;  %v1824_v26 = vsub.f32 %v540_v4, %v589_v6 }
  0x13   :  { %v1801_v15 = vpack.c.bf16 %v589_v6, %v586_v5  ;;  %v536_v17 = vld [vmem:[%s2236_s4 + $0x8] sm:$0xff]  ;;  %v1809_v18 = vpack.c.bf16 %v595_v13, %v592_v12  ;;  %v601_v20 = vand.u32 4294901760, %v544_v14  ;;  %v574_v22 = vsel %vm572_vm0, %v535_v16, 0  ;;  %v546_v23 = vld [vmem:[%s2237_s5 + $0x38] sm:$0xff]  ;;  %v1859_v41 = vld [vmem:[%s2237_s5 + $0x40] sm:$0xff] }
  0x14   :  { %v1820_v24 = vand.u32 4294901760, %v574_v22  ;;  %v1822_v25 = vsub.f32 %v539_v3, %v586_v5  ;;  %v577_v27 = vsel %vm572_vm0, %v536_v17, 0  ;;  %v604_v28 = vand.u32 4294901760, %v545_v21  ;;  %v537_v47 = vld [vmem:[%s2236_s4 + $0x10] sm:$0xff]  ;;  %v538_v52 = vld [vmem:[%s2236_s4 + $0x18] sm:$0xff] }
  0x15   :  { %62 = vperm.xlu1 %1652, %v1791_v10   ;;  %52 = vperm.xlu0 %1651, %v1796_v11   ;;  %v1834_v30 = vand.u32 4294901760, %v577_v27  ;;  %v1838_v31 = vpack.c.bf16 %v601_v20, %v598_v19  ;;  %v607_v32 = vand.u32 4294901760, %v546_v23  ;;  %v1840_v33 = vsub.f32 %v541_v7, %v592_v12 }
  0x16   :  { %1515 = vmatprep.subr.bf16.mxu1 %v1801_v15  ;;  %1563 = vmatprep.subr.bf16.mxu0 %v1801_v15  ;;  %v1832_v29 = vsub.f32 %v574_v22, %v1820_v24  ;;  %v1842_v34 = vsub.f32 %v542_v8, %v595_v13  ;;  %v702_v37 = vand.u32 4294901760, %v1822_v25  ;;  %v709_v38 = vand.u32 4294901760, %v1824_v26 }
  0x17   :  { %1517 = vmatpush3.bf16.msra.mxu1 %v1801_v15  ;;  %1565 = vmatpush3.bf16.msra.mxu0 %v1801_v15  ;;  %v1848_v39 = vsub.f32 %v577_v27, %v1834_v30  ;;  %v1852_v40 = vsub.f32 %v543_v9, %v598_v19  ;;  %v1862_v43 = vsub.f32 %v544_v14, %v601_v20  ;;  %v716_v45 = vand.u32 4294901760, %v1840_v33 }
  0x18   :  { %1519 = vmatprep.subr.bf16.mxu1 %v1809_v18  ;;  %1567 = vmatprep.subr.bf16.mxu0 %v1809_v18  ;;  %v661_v36 = vand.u32 4294901760, %v1832_v29  ;;  %v1866_v44 = vpack.c.bf16 %v607_v32, %v604_v28  ;;  %v723_v46 = vand.u32 4294901760, %v1842_v34  ;;  %v703_v49 = vsub.f32 %v1822_v25, %v702_v37 }
  0x19   :  { %1654 = vset.pattern.permute.xlu1 %v1701_v35  ;;  %1653 = vset.pattern.permute.xlu0 %v1701_v35  ;;  %v710_v50 = vsub.f32 %v1824_v26, %v709_v38  ;;  %v671_v51 = vand.u32 4294901760, %v1848_v39  ;;  %v1886_v53 = vand.u32 4294901760, %v1859_v41  ;;  %v730_v54 = vand.u32 4294901760, %v1852_v40 }
  0x1a   :  { %78 = vperm.xlu1 %1654, %v1796_v11   ;;  %74 = vperm.xlu0 %1653, %v1767_v1   ;;  %v662_v42 = vsub.f32 %v1832_v29, %v661_v36  ;;  %v737_v55 = vand.u32 4294901760, %v1862_v43  ;;  %v1892_v56 = vsub.f32 %v545_v21, %v604_v28  ;;  %v1894_v57 = vsub.f32 %v546_v23, %v607_v32 }
  0x1b   :  { %1521 = vmatpush3.bf16.msra.mxu1 %v1809_v18  ;;  %1569 = vmatpush3.bf16.msra.mxu0 %v1809_v18  ;;  %v580_v58 = vsel %vm572_vm0, %v537_v47, 0  ;;  %v717_v59 = vsub.f32 %v1840_v33, %v716_v45  ;;  %v724_v60 = vsub.f32 %v1842_v34, %v723_v46  ;;  %v583_v62 = vsel %vm572_vm0, %v538_v52, 0 }
  0x1c   :  { %1523 = vmatprep.subr.bf16.mxu1 %v1838_v31  ;;  %1571 = vmatprep.subr.bf16.mxu0 %v1838_v31  ;;  %v663_v48 = vand.u32 4294901760, %v662_v42  ;;  %v1905_v61 = vand.u32 4294901760, %v580_v58  ;;  %v704_v63 = vand.u32 4294901760, %v703_v49  ;;  %v711_v3 = vand.u32 4294901760, %v710_v50 }
  0x1d   :  { %1460 = vmatprep.mubr.f32.mxu0 %v661_v36  ;;  %v672_v4 = vsub.f32 %v1848_v39, %v671_v51  ;;  %v1911_v5 = vand.u32 4294901760, %v583_v62  ;;  %v1702_v6 = vmov 2   ;;  %v731_v7 = vsub.f32 %v1852_v40, %v730_v54 }
  0x1e   :  { %82 = vperm.xlu1 %1654, %v1762_v0   ;;  %86 = vperm.xlu0 %1653, %v1791_v10   ;;  %v1917_v8 = vsub.f32 %v580_v58, %v1905_v61  ;;  %v738_v9 = vsub.f32 %v1862_v43, %v737_v55  ;;  %v744_v12 = vand.u32 4294901760, %v1892_v56  ;;  %v751_v13 = vand.u32 4294901760, %v1894_v57 }
  0x1f   :  { %1525 = vmatpush3.bf16.msra.mxu1 %v1838_v31  ;;  %1573 = vmatpush3.bf16.msra.mxu0 %v1838_v31  ;;  %v718_v14 = vand.u32 4294901760, %v717_v59  ;;  %v725_v16 = vand.u32 4294901760, %v724_v60  ;;  %v1930_v19 = vsub.f32 %v583_v62, %v1911_v5  ;;  %v1530_v20 = vpack.c.bf16 %v711_v3, %v704_v63 }
  0x20   :  { %1527 = vmatprep.subr.bf16.mxu1 %v1866_v44  ;;  %1575 = vmatprep.subr.bf16.mxu0 %v1866_v44  ;;  %v681_v17 = vand.u32 4294901760, %v1917_v8  ;;  %v673_v21 = vand.u32 4294901760, %v672_v4  ;;  %v1578_v22 = vpack.c.bf16 %v709_v38, %v702_v37  ;;  %v732_v23 = vand.u32 4294901760, %v731_v7 }
  0x21   :  { %1388 = vmatprep.mubr.f32.mxu1 %v663_v48  ;;  %v1703_v27 = vmov 3   ;;  %v739_v28 = vand.u32 4294901760, %v738_v9  ;;  %v745_v32 = vsub.f32 %v1892_v56, %v744_v12  ;;  %v752_v35 = vsub.f32 %v1894_v57, %v751_v13 }
  0x22   :  { %1655 = vset.pattern.permute.xlu1 %v1702_v6  ;;  %1656 = vset.pattern.permute.xlu0 %v1702_v6  ;;  %v1943_v36 = vsub.f32 %v1859_v41, %v1886_v53  ;;  %v1534_v42 = vpack.c.bf16 %v725_v16, %v718_v14  ;;  %v682_v37 = vsub.f32 %v1917_v8, %v681_v17  ;;  %v691_v38 = vand.u32 4294901760, %v1930_v19  ;;  %v495_v16 = vld [vmem:[%s2235_s3 + $0x10] sm:$0xff] }
  0x23   :  { %102 = vperm.xlu1 %1655, %v1767_v1   ;;  %106 = vperm.xlu0 %1656, %v1796_v11   ;;  %v1582_v41 = vpack.c.bf16 %v723_v46, %v716_v45  ;;  %v1538_v47 = vpack.c.bf16 %v739_v28, %v732_v23  ;;  %v746_v48 = vand.u32 4294901760, %v745_v32  ;;  %v753_v49 = vand.u32 4294901760, %v752_v35 }
  0x24   :  { %1529 = vmatpush3.bf16.msra.mxu1 %v1866_v44  ;;  %1577 = vmatpush3.bf16.msra.mxu0 %v1866_v44  ;;  %v758_v50 = vand.u32 4294901760, %v1943_v36  ;;  %v683_v52 = vand.u32 4294901760, %v682_v37  ;;  %v692_v58 = vsub.f32 %v1930_v19, %v691_v38  ;;  %v1586_v45 = vpack.c.bf16 %v737_v55, %v730_v54 }
  0x25   :  { %1386 = vmatprep.subr.mxu1 %v1886_v53  ;;  %1458 = vmatprep.subr.mxu0 %v1886_v53  ;;  %v1542_v46 = vpack.c.bf16 %v753_v49, %v746_v48  ;;  %v1704_v60 = vmov 4   ;;  %v1590_v62 = vpack.c.bf16 %v751_v13, %v744_v12  ;;  %v1546_v54 = vpack.c.bf16 %v1824_v26, %v1822_v25 }
  0x26   :  { %v759_v59 = vsub.f32 %v1943_v36, %v758_v50  ;;  %v1705_v55 = vmov 5   ;;  %v1550_v3 = vpack.c.bf16 %v1842_v34, %v1840_v33  ;;  %v1554_v25 = vpack.c.bf16 %v1862_v43, %v1852_v40 }
  0x27   :  { %110 = vperm.xlu1 %1655, %v1762_v0   ;;  %1657 = vset.pattern.permute.xlu0 %v1703_v27  ;;  %v1558_v26 = vpack.c.bf16 %v1894_v57, %v1892_v56  ;;  %v1712_v33 = vmov 12   ;;  %v1713_v34 = vmov 13   ;;  %v1715_v40 = vmov 15   ;;  %v549_v57 = vld [vmem:[%s2238_s6 + $0x8] sm:$0xff] }
  0x28   :  { %1387 = vmatpush3.msra.mxu1 %v1886_v53  ;;  %130 = vperm.xlu0 %1657, %v1767_v1   ;;  %v760_v63 = vand.u32 4294901760, %v759_v59  ;;  %v65_v43 = vlaneseq }
  0x29   :  { %1531 = vmatprep.subr.bf16.mxu1 %v1530_v20  ;;  %1389 = vmatmul.mubr.f32.vlgmr.msra.gmra.mrb[0].mxu1 %v673_v21 }
  0x2a   :  { %1533 = vmatpush3.bf16.msra.mxu1 %v1530_v20  ;;  %1459 = vmatpush3.msra.mxu0 %v1886_v53 }
  0x2b   :  { %1579 = vmatprep.subr.bf16.mxu0 %v1578_v22  ;;  %114 = vperm.xlu1 %1655, %v1791_v10  }
  0x2c   :  { %1461 = vmatmul.mubr.f32.vlgmr.msra.gmra.mrb[0].mxu0 %v671_v51  ;;  %1535 = vmatprep.subr.bf16.mxu1 %v1534_v42  ;;  %v693_v51 = vand.u32 4294901760, %v692_v58 }
  0x2d   :  { %1581 = vmatpush3.bf16.msra.mxu0 %v1578_v22  ;;  %142 = vperm.xlu0 %1657, %v1791_v10  }
  0x2e   :  { %1537 = vmatpush3.bf16.msra.mxu1 %v1534_v42  ;;  %1583 = vmatprep.subr.bf16.mxu0 %v1582_v41 }
  0x2f   :  { %1658 = vset.pattern.permute.xlu1 %v1703_v27  ;;  %1539 = vmatprep.subr.bf16.mxu1 %v1538_v47 }
  0x30   :  { %134 = vperm.xlu1 %1658, %v1796_v11   ;;  %1391 = vmatprep.mubr.f32.mxu1 %v683_v52 }
  0x31   :  { %1585 = vmatpush3.bf16.msra.mxu0 %v1582_v41  ;;  %1660 = vset.pattern.permute.xlu0 %v1704_v60 }
  0x32   :  { %1541 = vmatpush3.bf16.msra.mxu1 %v1538_v47  ;;  %162 = vperm.xlu0 %1660, %v1796_v11  }
  0x33   :  { %1587 = vmatprep.subr.bf16.mxu0 %v1586_v45  ;;  %1543 = vmatprep.subr.bf16.mxu1 %v1542_v46 }
  0x34   :  { %138 = vperm.xlu1 %1658, %v1762_v0   ;;  %1392 = vmatmul.mubr.f32.gmra.mrb[2].mxu1 %v693_v51 }
  0x35   :  { %1589 = vmatpush3.bf16.msra.mxu0 %v1586_v45  ;;  %1463 = vmatprep.mubr.f32.mxu0 %v681_v17 }
  0x36   :  { %1545 = vmatpush3.bf16.msra.mxu1 %v1542_v46  ;;  %1591 = vmatprep.subr.bf16.mxu0 %v1590_v62 }
  0x37   :  { %1410 = vmatprep.subr.mxu1 %v760_v63  ;;  %1464 = vmatmul.mubr.f32.gmra.mrb[2].mxu0 %v691_v38 }
  0x38   :  { %1659 = vset.pattern.permute.xlu1 %v1704_v60  ;;  %1661 = vset.pattern.permute.xlu0 %v1705_v55 }
  0x39   :  { %1593 = vmatpush3.bf16.msra.mxu0 %v1590_v62  ;;  %158 = vperm.xlu1 %1659, %v1767_v1  }
  0x3a   :  { %1411 = vmatpush3.msra.mxu1 %v760_v63  ;;  %1412 = vmatprep.mubr.f32.mxu1 %v1820_v24 }
  0x3b   :  { %1547 = vmatprep.subr.bf16.mxu1 %v1546_v54  ;;  %1482 = vmatprep.subr.mxu0 %v758_v50 }
  0x3c   :  { %186 = vperm.xlu0 %1661, %v1767_v1   ;;  %1413 = vmatmul.mubr.f32.vlgmr.msra.gmra.mrb[0].mxu1 %v1834_v30 }
  0x3d   :  { %1549 = vmatpush3.bf16.msra.mxu1 %v1546_v54  ;;  %1483 = vmatpush3.msra.mxu0 %v758_v50 }
  0x3e   :  { %1484 = vmatprep.mubr.f32.mxu0 %v1820_v24  ;;  %1595 = vmatprep.subr.bf16.mxu0 %v1801_v15 }
  0x3f   :  { %166 = vperm.xlu1 %1659, %v1762_v0   ;;  %1485 = vmatmul.mubr.f32.vlgmr.msra.gmra.mrb[0].mxu0 %v1834_v30 }
  0x40   :  { %1597 = vmatpush3.bf16.msra.mxu0 %v1801_v15  ;;  %1551 = vmatprep.subr.bf16.mxu1 %v1550_v3  ;;  %v1706_v15 = vmov 6  }
  0x41   :  { %1553 = vmatpush3.bf16.msra.mxu1 %v1550_v3  ;;  %1599 = vmatprep.subr.bf16.mxu0 %v1809_v18 }
  0x42   :  { %1555 = vmatprep.subr.bf16.mxu1 %v1554_v25  ;;  %198 = vperm.xlu0 %1661, %v1791_v10  }
  0x43   :  { %170 = vperm.xlu1 %1659, %v1791_v10   ;;  %1415 = vmatprep.mubr.f32.mxu1 %v1905_v61 }
  0x44   :  { %1601 = vmatpush3.bf16.msra.mxu0 %v1809_v18  ;;  %1416 = vmatmul.mubr.f32.gmra.mrb[2].mxu1 %v1911_v5  ;;  %v1707_v18 = vmov 7  }
  0x45   :  { %1557 = vmatpush3.bf16.msra.mxu1 %v1554_v25  ;;  %1603 = vmatprep.subr.bf16.mxu0 %v1838_v31 }
  0x46   :  { %1559 = vmatprep.subr.bf16.mxu1 %v1558_v26  ;;  %1664 = vset.pattern.permute.xlu0 %v1706_v15 }
  0x47   :  { %1662 = vset.pattern.permute.xlu1 %v1705_v55  ;;  %218 = vperm.xlu0 %1664, %v1796_v11  }
  0x48   :  { %1605 = vmatpush3.bf16.msra.mxu0 %v1838_v31  ;;  %190 = vperm.xlu1 %1662, %v1796_v11   ;;  %v1711_v31 = vmov 11  }
  0x49   :  { %1561 = vmatpush3.bf16.msra.mxu1 %v1558_v26  ;;  %1607 = vmatprep.subr.bf16.mxu0 %v1866_v44 }
  0x4a   :  { %1487 = vmatprep.mubr.f32.mxu0 %v1905_v61  ;;  %1434 = vmatprep.subr.mxu1 %v1943_v36 }
  0x4b   :  { %1488 = vmatmul.mubr.f32.gmra.mrb[2].mxu0 %v1911_v5  ;;  %1436 = vmatprep.mubr.f32.mxu1 %v1832_v29  ;;  %v1709_v29 = vmov 9  }
  0x4c   :  { %1609 = vmatpush3.bf16.msra.mxu0 %v1866_v44  ;;  %194 = vperm.xlu1 %1662, %v1762_v0   ;;  %v2042_v44 = vshrl.u32 %v65_v43, 7 }
  0x4d   :  { %1435 = vmatpush3.msra.mxu1 %v1943_v36  ;;  %1506 = vmatprep.subr.mxu0 %v1886_v53 }
  0x4e   :  { %1437 = vmatmul.mubr.f32.vlgmr.msra.gmra.mrb[0].mxu1 %v1848_v39  ;;  %1508 = vmatprep.mubr.f32.mxu0 %v1820_v24  ;;  %v1708_v24 = vmov 8   ;;  %v1714_v39 = vmov 14   ;;  %v91_v4 = vsub.s32 1, %v2042_v44  ;;  %v119_v22 = vsub.s32 2, %v2042_v44 }
  0x4f   :  { %1665 = vset.pattern.permute.xlu0 %v1707_v18  ;;  %1439 = vmatprep.mubr.f32.mxu1 %v1917_v8  ;;  %v493_v8 = vld [vmem:[%s2235_s3] sm:$0xff]  ;;  %v147_v51 = vsub.s32 3, %v2042_v44 }
  0x50   :  { %1507 = vmatpush3.msra.mxu0 %v1886_v53  ;;  %1663 = vset.pattern.permute.xlu1 %v1706_v15 }
  0x51   :  { %1509 = vmatmul.mubr.f32.vlgmr.msra.gmra.mrb[0].mxu0 %v1834_v30  ;;  %214 = vperm.xlu1 %1663, %v1767_v1   ;;  %v1710_v30 = vmov 10  }
  0x52   :  { %242 = vperm.xlu0 %1665, %v1767_v1   ;;  %1440 = vmatmul.mubr.f32.gmra.mrb[2].mxu1 %v1930_v19 }
  0x53   :  { %1511 = vmatprep.mubr.f32.mxu0 %v1905_v61  ;;  %v67_v61 = vsub.s32 0, %v2042_v44 }
  0x55   :  { %222 = vperm.xlu1 %1663, %v1762_v0   ;;  %1512 = vmatmul.mubr.f32.gmra.mrb[2].mxu0 %v1911_v5  ;;  %v2054_v5 = vld [vmem:[%s2234_s2] sm:$0xff] }
  0x56   :  { %254 = vperm.xlu0 %1665, %v1791_v10   ;;  %v68_v9 = vrot.slane %v2054_v5, %v67_v61  ;;  %v92_v12 = vrot.slane %v2054_v5, %v91_v4  ;;  %v120_v38 = vrot.slane %v2054_v5, %v119_v22  ;;  %v148_v54 = vrot.slane %v2054_v5, %v147_v51 }
  0x59   :  { %226 = vperm.xlu1 %1663, %v1791_v10  }
  0x5a   :  { %1668 = vset.pattern.permute.xlu0 %v1708_v24 }
  0x5b   :  { %274 = vperm.xlu0 %1668, %v1796_v11  }
  0x5d   :  { %1666 = vset.pattern.permute.xlu1 %v1707_v18 }
  0x5e   :  { %246 = vperm.xlu1 %1666, %v1796_v11  }
  0x5f   :  { %1669 = vset.pattern.permute.xlu0 %v1709_v29 }
  0x60   :  { %298 = vperm.xlu0 %1669, %v1767_v1  }
  0x62   :  { %250 = vperm.xlu1 %1666, %v1762_v0  }
  0x64   :  { %310 = vperm.xlu0 %1669, %v1791_v10  }
  0x66   :  { %1667 = vset.pattern.permute.xlu1 %v1708_v24 }
  0x67   :  { %270 = vperm.xlu1 %1667, %v1767_v1  }
  0x68   :  { %1672 = vset.pattern.permute.xlu0 %v1710_v30 }
  0x69   :  { %330 = vperm.xlu0 %1672, %v1796_v11  }
  0x6b   :  { %278 = vperm.xlu1 %1667, %v1762_v0  }
  0x6d   :  { %1673 = vset.pattern.permute.xlu0 %v1711_v31 }
  0x6e   :  { %354 = vperm.xlu0 %1673, %v1767_v1  }
  0x6f   :  { %282 = vperm.xlu1 %1667, %v1791_v10  }
  0x72   :  { %366 = vperm.xlu0 %1673, %v1791_v10  }
  0x73   :  { %1670 = vset.pattern.permute.xlu1 %v1709_v29 }
  0x74   :  { %302 = vperm.xlu1 %1670, %v1796_v11  }
  0x76   :  { %1676 = vset.pattern.permute.xlu0 %v1712_v33 }
  0x77   :  { %386 = vperm.xlu0 %1676, %v1796_v11  }
  0x78   :  { %306 = vperm.xlu1 %1670, %v1762_v0  }
  0x7b   :  { %1677 = vset.pattern.permute.xlu0 %v1713_v34 }
  0x7c   :  { %1671 = vset.pattern.permute.xlu1 %v1710_v30  ;;  %410 = vperm.xlu0 %1677, %v1767_v1   ;;  %v175_v30 = vsub.s32 4, %v2042_v44 }
  0x7d   :  { %326 = vperm.xlu1 %1671, %v1767_v1  }
  0x80   :  { %422 = vperm.xlu0 %1677, %v1791_v10  }
  0x81   :  { %334 = vperm.xlu1 %1671, %v1762_v0  }
  0x84   :  { %1680 = vset.pattern.permute.xlu0 %v1714_v39 }
  0x85   :  { %338 = vperm.xlu1 %1671, %v1791_v10   ;;  %442 = vperm.xlu0 %1680, %v1796_v11  }
  0x89   :  { %1674 = vset.pattern.permute.xlu1 %v1711_v31  ;;  %1681 = vset.pattern.permute.xlu0 %v1715_v40 }
  0x8a   :  { %358 = vperm.xlu1 %1674, %v1796_v11   ;;  %466 = vperm.xlu0 %1681, %v1767_v1  }
  0x8e   :  { %362 = vperm.xlu1 %1674, %v1762_v0   ;;  %478 = vperm.xlu0 %1681, %v1791_v10  }
  0x90   :  { %v58_v53 = vpop.permute.xlu1 %57  ;;  %v48_v56 = vpop.permute.xlu0 %47 }
  0x91   :  { %v69_v13 = vmul.f32 %v68_v9, %v48_v56  ;;  %v71_v35 = vmul.f32 %v68_v9, %v58_v53 }
  0x92   :  { %1675 = vset.pattern.permute.xlu1 %v1712_v33  ;;  %1684 = vset.pattern.permute.xlu0 %v1700_v2 }
  0x93   :  { %382 = vperm.xlu1 %1675, %v1767_v1   ;;  %559 = vperm.xlu0 %1684, %v549_v57   ;;  %v548_v57 = vld [vmem:[%s2238_s6] sm:$0xff] }
  0x94   :  { %v63_v6 = vpop.permute.xlu1 %62  ;;  %v53_v7 = vpop.permute.xlu0 %52 }
  0x95   :  { %v70_v14 = vmul.f32 %v68_v9, %v53_v7  ;;  %v72_v36 = vmul.f32 %v68_v9, %v63_v6  ;;  %v203_v9 = vsub.s32 5, %v2042_v44 }
  0x97   :  { %390 = vperm.xlu1 %1675, %v1762_v0   ;;  %499 = vperm.xlu0 %1684, %v493_v8  }
  0x99   :  { %v79_v17 = vpop.permute.xlu1 %78  ;;  %v75_v19 = vpop.permute.xlu0 %74 }
  0x9a   :  { %v94_v20 = vmul.f32 %v92_v12, %v79_v17  ;;  %v93_v21 = vmul.f32 %v92_v12, %v75_v19 }
  0x9b   :  { %394 = vperm.xlu1 %1675, %v1791_v10   ;;  %509 = vperm.xlu0 %1684, %v495_v16   ;;  %v204_v16 = vrot.slane %v2054_v5, %v203_v9 }
  0x9c   :  { %v98_v23 = vadd.f32 %v94_v20, %v70_v14  ;;  %v97_v27 = vadd.f32 %v93_v21, %v69_v13  ;;  %v551_v14 = vld [vmem:[%s2238_s6 + $0x18] sm:$0xff] }
  0x9d   :  { %v83_v28 = vpop.permute.xlu1 %82  ;;  %v87_v32 = vpop.permute.xlu0 %86 }
  0x9e   :  { %v95_v42 = vmul.f32 %v92_v12, %v83_v28  ;;  %v96_v37 = vmul.f32 %v92_v12, %v87_v32  ;;  %v231_v32 = vsub.s32 6, %v2042_v44 }
  0x9f   :  { %1678 = vset.pattern.permute.xlu1 %v1713_v34 }
  0xa0   :  { %v99_v41 = vadd.f32 %v95_v42, %v71_v35  ;;  %v100_v47 = vadd.f32 %v96_v37, %v72_v36  ;;  %414 = vperm.xlu1 %1678, %v1796_v11   ;;  %v496_v42 = vld [vmem:[%s2235_s3 + $0x18] sm:$0xff] }
  0xa2   :  { %v103_v48 = vpop.permute.xlu1 %102  ;;  %v107_v49 = vpop.permute.xlu0 %106 }
  0xa3   :  { %v121_v50 = vmul.f32 %v120_v38, %v103_v48  ;;  %v122_v52 = vmul.f32 %v120_v38, %v107_v49 }
  0xa4   :  { %418 = vperm.xlu1 %1678, %v1762_v0  }
  0xa5   :  { %v125_v58 = vadd.f32 %v121_v50, %v97_v27  ;;  %v126_v45 = vadd.f32 %v122_v52, %v98_v23  ;;  %v494_v23 = vld [vmem:[%s2235_s3 + $0x8] sm:$0xff] }
  0xa6   :  { %v111_v46 = vpop.permute.xlu1 %110 }
  0xa7   :  { %v123_v59 = vmul.f32 %v120_v38, %v111_v46  ;;  %v131_v60 = vpop.permute.xlu0 %130 }
  0xa8   :  { %1679 = vset.pattern.permute.xlu1 %v1714_v39  ;;  %v149_v33 = vmul.f32 %v148_v54, %v131_v60  ;;  %v176_v39 = vrot.slane %v2054_v5, %v175_v30 }
  0xa9   :  { %v127_v62 = vadd.f32 %v123_v59, %v99_v41  ;;  %438 = vperm.xlu1 %1679, %v1767_v1   ;;  %v232_v41 = vrot.slane %v2054_v5, %v231_v32 }
  0xaa   :  { %v115_v63 = vpop.permute.xlu1 %114  ;;  %v153_v53 = vadd.f32 %v149_v33, %v125_v58 }
  0xab   :  { %v124_v55 = vmul.f32 %v120_v38, %v115_v63 }
  0xac   :  { %v143_v3 = vpop.permute.xlu0 %142 }
  0xad   :  { %v128_v25 = vadd.f32 %v124_v55, %v100_v47  ;;  %446 = vperm.xlu1 %1679, %v1762_v0   ;;  %v152_v26 = vmul.f32 %v148_v54, %v143_v3 }
  0xaf   :  { %v156_v15 = vadd.f32 %v152_v26, %v128_v25  ;;  %v135_v18 = vpop.permute.xlu1 %134 }
  0xb0   :  { %v150_v24 = vmul.f32 %v148_v54, %v135_v18 }
  0xb1   :  { %450 = vperm.xlu1 %1679, %v1791_v10   ;;  %v163_v7 = vpop.permute.xlu0 %162 }
  0xb2   :  { %v154_v29 = vadd.f32 %v150_v24, %v126_v45  ;;  %v178_v13 = vmul.f32 %v176_v39, %v163_v7 }
  0xb3   :  { %v139_v1 = vpop.permute.xlu1 %138 }
  0xb4   :  { %v151_v31 = vmul.f32 %v148_v54, %v139_v1  ;;  %v182_v20 = vadd.f32 %v178_v13, %v154_v29 }
  0xb5   :  { %1682 = vset.pattern.permute.xlu1 %v1715_v40 }
  0xb6   :  { %v155_v34 = vadd.f32 %v151_v31, %v127_v62  ;;  %470 = vperm.xlu1 %1682, %v1796_v11   ;;  %v550_v11 = vld [vmem:[%s2238_s6 + $0x10] sm:$0xff]  ;;  %v259_v62 = vsub.s32 7, %v2042_v44 }
  0xb8   :  { %v159_v43 = vpop.permute.xlu1 %158 }
  0xb9   :  { %v177_v56 = vmul.f32 %v176_v39, %v159_v43 }
  0xba   :  { %474 = vperm.xlu1 %1682, %v1762_v0  }
  0xbb   :  { %v181_v10 = vadd.f32 %v177_v56, %v153_v53  ;;  %v187_v17 = vpop.permute.xlu0 %186 }
  0xbc   :  { %v205_v37 = vmul.f32 %v204_v16, %v187_v17 }
  0xbe   :  { %1683 = vset.pattern.permute.xlu1 %v1700_v2  ;;  %v167_v40 = vpop.permute.xlu1 %166  ;;  %v209_v48 = vadd.f32 %v205_v37, %v181_v10 }
  0xbf   :  { %v179_v6 = vmul.f32 %v176_v39, %v167_v40  ;;  %554 = vperm.xlu1 %1683, %v548_v57  }
  0xc1   :  { %v183_v8 = vadd.f32 %v179_v6, %v155_v34  ;;  %v199_v28 = vpop.permute.xlu0 %198  ;;  %v2123_v34 = vld [vmem:[%s2234_s2 + $0x8] sm:$0xff]  ;;  %s525_s2 = sld [smem:[#allocation2]] }
  0xc2   :  { %v171_v12 = vpop.permute.xlu1 %170  ;;  %v208_v45 = vmul.f32 %v204_v16, %v199_v28  ;;  %v288_v10 = vrot.slane %v2123_v34, %v67_v61 }
  0xc3   :  { %v180_v0 = vmul.f32 %v176_v39, %v171_v12  ;;  %564 = vperm.xlu1 %1683, %v550_v11  }
  0xc5   :  { %v184_v2 = vadd.f32 %v180_v0, %v156_v15  ;;  %v260_v15 = vrot.slane %v2054_v5, %v259_v62 }
  0xc6   :  { %v219_v49 = vpop.permute.xlu0 %218 }
  0xc7   :  { %569 = vperm.xlu1 %1683, %v551_v14   ;;  %v191_v19 = vpop.permute.xlu1 %190  ;;  %v212_v54 = vadd.f32 %v208_v45, %v184_v2  ;;  %v234_v25 = vmul.f32 %v232_v41, %v219_v49 }
  0xc8   :  { %v206_v21 = vmul.f32 %v204_v16, %v191_v19 }
  0xca   :  { %v210_v27 = vadd.f32 %v206_v21, %v182_v20  ;;  %v2139_v20 = vrot.slane %v2123_v34, %v91_v4 }
  0xcb   :  { %504 = vperm.xlu1 %1683, %v494_v23   ;;  %v195_v35 = vpop.permute.xlu1 %194 }
  0xcc   :  { %v207_v36 = vmul.f32 %v204_v16, %v195_v35  ;;  %v238_v24 = vadd.f32 %v234_v25, %v210_v27 }
  0xce   :  { %v211_v38 = vadd.f32 %v207_v36, %v183_v8 }
  0xcf   :  { %514 = vperm.xlu1 %1683, %v496_v42  }
  0xd0   :  { %v215_v47 = vpop.permute.xlu1 %214 }
  0xd1   :  { %v233_v50 = vmul.f32 %v232_v41, %v215_v47  ;;  %v243_v46 = vpop.permute.xlu0 %242 }
  0xd2   :  { %v261_v43 = vmul.f32 %v260_v15, %v243_v46 }
  0xd3   :  { %v237_v52 = vadd.f32 %v233_v50, %v209_v48 }
  0xd4   :  { %v223_v58 = vpop.permute.xlu1 %222 }
  0xd5   :  { %v235_v59 = vmul.f32 %v232_v41, %v223_v58  ;;  %v255_v3 = vpop.permute.xlu0 %254  ;;  %v265_v57 = vadd.f32 %v261_v43, %v237_v52 }
  0xd6   :  { %v264_v8 = vmul.f32 %v260_v15, %v255_v3  ;;  %v344_v3 = vrot.slane %v2123_v34, %v119_v22 }
  0xd7   :  { %v239_v60 = vadd.f32 %v235_v59, %v211_v38 }
  0xd8   :  { %v227_v63 = vpop.permute.xlu1 %226 }
  0xd9   :  { %v236_v55 = vmul.f32 %v232_v41, %v227_v63 }
  0xda   :  { %v275_v1 = vpop.permute.xlu0 %274 }
  0xdb   :  { %v240_v26 = vadd.f32 %v236_v55, %v212_v54  ;;  %v290_v17 = vmul.f32 %v288_v10, %v275_v1 }
  0xdd   :  { %v247_v18 = vpop.permute.xlu1 %246  ;;  %v268_v2 = vadd.f32 %v264_v8, %v240_v26 }
  0xde   :  { %v262_v29 = vmul.f32 %v260_v15, %v247_v18 }
  0xdf   :  { %v299_v53 = vpop.permute.xlu0 %298 }
  0xe0   :  { %v266_v31 = vadd.f32 %v262_v29, %v238_v24  ;;  %v317_v55 = vmul.f32 %v2139_v20, %v299_v53  ;;  %v372_v24 = vrot.slane %v2123_v34, %v147_v51 }
  0xe1   :  { %v251_v33 = vpop.permute.xlu1 %250 }
  0xe2   :  { %v263_v39 = vmul.f32 %v260_v15, %v251_v33  ;;  %v294_v23 = vadd.f32 %v290_v17, %v266_v31 }
  0xe3   :  { %v2128_v6 = vpop.permute.xlu0 %310 }
  0xe4   :  { %v267_v56 = vadd.f32 %v263_v39, %v239_v60  ;;  %v320_v44 = vmul.f32 %v2139_v20, %v2128_v6 }
  0xe6   :  { %v271_v5 = vpop.permute.xlu1 %270 }
  0xe7   :  { %v289_v40 = vmul.f32 %v288_v10, %v271_v5 }
  0xe8   :  { %v2132_v13 = vpop.permute.xlu0 %330 }
  0xe9   :  { %v293_v11 = vadd.f32 %v289_v40, %v265_v57  ;;  %v428_v57 = vrot.slane %v2123_v34, %v203_v9 }
  0xea   :  { %v279_v7 = vpop.permute.xlu1 %278 }
  0xeb   :  { %v291_v12 = vmul.f32 %v288_v10, %v279_v7  ;;  %v321_v39 = vadd.f32 %v317_v55, %v293_v11 }
  0xed   :  { %v2130_v0 = vadd.f32 %v291_v12, %v267_v56  ;;  %v355_v61 = vpop.permute.xlu0 %354  ;;  %v400_v56 = vrot.slane %v2123_v34, %v175_v30  ;;  %v456_v30 = vrot.slane %v2123_v34, %v231_v32 }
  0xee   :  { %v283_v14 = vpop.permute.xlu1 %282  ;;  %v373_v53 = vmul.f32 %v372_v24, %v355_v61 }
  0xef   :  { %v292_v16 = vmul.f32 %v288_v10, %v283_v14 }
  0xf1   :  { %v2134_v19 = vadd.f32 %v292_v16, %v268_v2  ;;  %v2142_v28 = vpop.permute.xlu0 %366  ;;  %v2192_v16 = vrot.slane %v2123_v34, %v259_v62  ;;  %v346_v62 = vmul.f32 %v344_v3, %v2132_v13 }
  0xf2   :  { %v376_v6 = vmul.f32 %v372_v24, %v2142_v28 }
  0xf3   :  { %v303_v21 = vpop.permute.xlu1 %302 }
  0xf4   :  { %v318_v27 = vmul.f32 %v2139_v20, %v303_v21 }
  0xf6   :  { %v2144_v35 = vadd.f32 %v318_v27, %v294_v23  ;;  %v2146_v42 = vpop.permute.xlu0 %386 }
  0xf7   :  { %v307_v36 = vpop.permute.xlu1 %306 }
  0xf8   :  { %v319_v8 = vmul.f32 %v2139_v20, %v307_v36 }
  0xfa   :  { %v323_v9 = vadd.f32 %v319_v8, %v2130_v0 }
  0xfb   :  { %v411_v41 = vpop.permute.xlu0 %410 }
  0xfc   :  { %v327_v37 = vpop.permute.xlu1 %326  ;;  %v429_v12 = vmul.f32 %v428_v57, %v411_v41 }
  0xfd   :  { %v345_v18 = vmul.f32 %v344_v3, %v327_v37 }
  0xff   :  { %v2148_v48 = vpop.permute.xlu0 %422  ;;  %v349_v22 = vadd.f32 %v345_v18, %v321_v39  ;;  %v350_v18 = vadd.f32 %v346_v62, %v2144_v35 }
 0x100   :  { %v335_v38 = vpop.permute.xlu1 %334 }
 0x101   :  { %v377_v7 = vadd.f32 %v373_v53, %v349_v22  ;;  %v347_v2 = vmul.f32 %v344_v3, %v335_v38 }
 0x103   :  { %v351_v27 = vadd.f32 %v347_v2, %v323_v9 }
 0x104   :  { %v339_v47 = vpop.permute.xlu1 %338  ;;  %v2150_v50 = vpop.permute.xlu0 %442 }
 0x109   :  { %v359_v49 = vpop.permute.xlu1 %358  ;;  %v467_v58 = vpop.permute.xlu0 %466 }
 0x10a   :  { %v485_v37 = vmul.f32 %v2192_v16, %v467_v58  ;;  %v324_v58 = vadd.f32 %v320_v44, %v2134_v19 }
 0x10d   :  { %v363_v4 = vpop.permute.xlu1 %362  ;;  %v2152_v46 = vpop.permute.xlu0 %478 }
 0x10e   :  { %v375_v21 = vmul.f32 %v372_v24, %v363_v4  ;;  %v374_v4 = vmul.f32 %v372_v24, %v359_v49  ;;  %v432_v24 = vmul.f32 %v428_v57, %v2148_v48 }
 0x110   :  { %v378_v20 = vadd.f32 %v374_v4, %v350_v18 }
 0x112   :  { %v383_v52 = vpop.permute.xlu1 %382  ;;  %v560_v63 = vpop.permute.xlu0 %559 }
 0x113   :  { %v401_v40 = vmul.f32 %v400_v56, %v383_v52  ;;  %v379_v52 = vadd.f32 %v375_v21, %v351_v27 }
 0x115   :  { %v405_v14 = vadd.f32 %v401_v40, %v377_v7 }
 0x116   :  { %v391_v45 = vpop.permute.xlu1 %390 }
 0x117   :  { %v433_v23 = vadd.f32 %v429_v12, %v405_v14  ;;  %v403_v36 = vmul.f32 %v400_v56, %v391_v45  ;;  %v1269_v14 = vstv %s1291_s29 }
 0x119   :  { %v407_v34 = vadd.f32 %v403_v36, %v379_v52 }
 0x11a   :  { %v2154_v59 = vpop.permute.xlu1 %394 }
 0x11b   :  { %v404_v22 = vmul.f32 %v400_v56, %v2154_v59 }
 0x11f   :  { %v2156_v60 = vpop.permute.xlu1 %414 }
 0x120   :  { %v430_v19 = vmul.f32 %v428_v57, %v2156_v60 }
 0x121   :  { %v1438_v54 = vpop.f32.mrb[0].mxu1 }
 0x122   :  { %v1610_v25 = vadd.f32 %v1438_v54, %v560_v63  ;;  %v2162_v26 = vpop.f32.mrb[1].mxu1  ;;  %v348_v54 = vmul.f32 %v344_v3, %v339_v47  ;;  %v402_v47 = vmul.f32 %v400_v56, %v2146_v42  ;;  %v526_v3 = vstv %s525_s2 }
 0x123   :  { %v419_v15 = vpop.permute.xlu1 %418  ;;  %v458_v42 = vmul.f32 %v456_v30, %v2150_v50 }
 0x124   :  { %v1510_v29 = vpop.f32.mrb[0].mxu0  ;;  %v431_v63 = vmul.f32 %v428_v57, %v419_v15  ;;  %v352_v39 = vadd.f32 %v348_v54, %v324_v58 }
 0x125   :  { %v2167_v1 = vadd.f32 %v1610_v25, %v1510_v29  ;;  %v2169_v31 = vpop.f32.mrb[1].mxu0  ;;  %v2171_v33 = vpop.f32.mrb[2].mxu1 }
 0x126   :  { %v2173_v43 = vpop.f32.mrb[3].mxu1  ;;  %v435_v55 = vadd.f32 %v431_v63, %v407_v34  ;;  %v500_v25 = vpop.permute.xlu0 %499  ;;  %v380_v7 = vadd.f32 %v376_v6, %v352_v39 }
 0x127   :  { %v1271_v44 = vmul.f32 %v2167_v1, %v1269_v14  ;;  %vm1265_vm5 = vcmp.ge.f32.partialorder %v2167_v1, 0.0 }
 0x128   :  { %v439_v10 = vpop.permute.xlu1 %438  ;;  %v2178_v5 = vpop.f32.mrb[2].mxu0  ;;  %v408_v12 = vadd.f32 %v404_v22, %v380_v7 }
 0x129   :  { %v2180_v51 = vpop.f32.mrb[3].mxu0  ;;  %v457_v17 = vmul.f32 %v456_v30, %v439_v10  ;;  %v1275_v34 = vsel %vm1265_vm5, %v2167_v1, %v1271_v44 }
 0x12a   :  { %v510_v53 = vpop.permute.xlu0 %509  ;;  %v436_v27 = vadd.f32 %v432_v24, %v408_v12 }
 0x12b   :  { %v461_v41 = vadd.f32 %v457_v17, %v433_v23 }
 0x12c   :  { %v447_v11 = vpop.permute.xlu1 %446 }
 0x12d   :  { %v459_v38 = vmul.f32 %v456_v30, %v447_v11  ;;  %v489_v0 = vadd.f32 %v485_v37, %v461_v41  ;;  %v406_v11 = vadd.f32 %v402_v47, %v378_v20 }
 0x12f   :  { %v463_v29 = vadd.f32 %v459_v38, %v435_v55  ;;  %v517_v13 = vadd.f32 %v500_v25, %v489_v0  ;;  %v434_v56 = vadd.f32 %v430_v19, %v406_v11 }
 0x130   :  { %v451_v61 = vpop.permute.xlu1 %450 }
 0x131   :  { %v527_v35 = vmul.f32 %v526_v3, %v517_v13  ;;  %vm521_vm1 = vcmp.ge.f32.partialorder %v517_v13, 0.0  ;;  %v460_v17 = vmul.f32 %v456_v30, %v451_v61  ;;  %v462_v37 = vadd.f32 %v458_v42, %v434_v56 }
 0x133   :  { %v464_v41 = vadd.f32 %v460_v17, %v436_v27 }
 0x135   :  { %v471_v32 = vpop.permute.xlu1 %470 }
 0x136   :  { %v486_v9 = vmul.f32 %v2192_v16, %v471_v32 }
 0x138   :  { %v490_v52 = vadd.f32 %v486_v9, %v462_v37 }
 0x139   :  { %v475_v45 = vpop.permute.xlu1 %474 }
 0x13a   :  { %v487_v15 = vmul.f32 %v2192_v16, %v475_v45 }
 0x13c   :  { %v491_v49 = vadd.f32 %v487_v15, %v463_v29 }
 0x13e   :  { %v555_v10 = vpop.permute.xlu1 %554  ;;  %v519_v8 = vadd.f32 %v510_v53, %v491_v49 }
 0x13f   :  { %v1612_v40 = vadd.f32 %v2162_v26, %v555_v10  ;;  %v531_v26 = vsel %vm521_vm1, %v517_v13, %v527_v35 }
 0x140   :  { %v529_v21 = vmul.f32 %v526_v3, %v519_v8  ;;  %vm523_vm3 = vcmp.ge.f32.partialorder %v519_v8, 0.0 }
 0x141   :  { %v1613_v28 = vadd.f32 %v1612_v40, %v2169_v31 }
 0x142   :  { %v565_v59 = vpop.permute.xlu1 %564  ;;  %v533_v30 = vsel %vm523_vm3, %v519_v8, %v529_v21 }
 0x143   :  { %vm1264_vm2 = vcmp.ge.f32.partialorder %v1613_v28, 0.0  ;;  %v1270_v2 = vmul.f32 %v1613_v28, %v1269_v14  ;;  %v1616_v60 = vadd.f32 %v2173_v43, %v565_v59  ;;  %v488_v43 = vmul.f32 %v2192_v16, %v2152_v46 }
 0x145   :  { %v1274_v23 = vsel %vm1264_vm2, %v1613_v28, %v1270_v2  ;;  %v1617_v31 = vadd.f32 %v1616_v60, %v2180_v51 }
 0x146   :  { %v1278_v48 = vsub.f32 %v531_v26, %v1274_v23  ;;  %v570_v50 = vpop.permute.xlu1 %569 }
 0x147   :  { %vm1266_vm4 = vcmp.ge.f32.partialorder %v1617_v31, 0.0  ;;  %v1272_v57 = vmul.f32 %v1617_v31, %v1269_v14  ;;  %v1614_v36 = vadd.f32 %v2171_v33, %v570_v50  ;;  %v492_v33 = vadd.f32 %v488_v43, %v464_v41 }
 0x148   :  { %1282 = vst [vmem:[%s2239_s7] sm:$0xff] %v1278_v48 }
 0x149   :  { %v1276_v61 = vsel %vm1266_vm4, %v1617_v31, %v1272_v57  ;;  %v1615_v51 = vadd.f32 %v1614_v36, %v2178_v5 }
 0x14a   :  { %v1280_v63 = vsub.f32 %v533_v30, %v1276_v61  ;;  %v505_v32 = vpop.permute.xlu1 %504 }
 0x14b   :  { %v518_v62 = vadd.f32 %v505_v32, %v490_v52  ;;  %v1273_v38 = vmul.f32 %v1615_v51, %v1269_v14  ;;  %vm1267_vm7 = vcmp.ge.f32.partialorder %v1615_v51, 0.0 }
 0x14c   :  { %1284 = vst [vmem:[%s2239_s7 + $0x10] sm:$0xff] %v1280_v63 }
 0x14d   :  { %vm522_vm6 = vcmp.ge.f32.partialorder %v518_v62, 0.0  ;;  %v528_v46 = vmul.f32 %v526_v3, %v518_v62  ;;  %v1277_v55 = vsel %vm1267_vm7, %v1615_v51, %v1273_v38 }
 0x14e   :  { %v515_v16 = vpop.permute.xlu1 %514 }
 0x14f   :  { %v532_v5 = vsel %vm522_vm6, %v518_v62, %v528_v46  ;;  %v520_v54 = vadd.f32 %v515_v16, %v492_v33 }
 0x150   :  { %v1279_v0 = vsub.f32 %v532_v5, %v1275_v34 }
 0x151   :  { %vm524_vm8 = vcmp.ge.f32.partialorder %v520_v54, 0.0  ;;  %v530_v4 = vmul.f32 %v526_v3, %v520_v54 }
 0x152   :  { %1283 = vst [vmem:[%s2239_s7 + $0x8] sm:$0xff] %v1279_v0 }
 0x153   :  { %v534_v25 = vsel %vm524_vm8, %v520_v54, %v530_v4 }
 0x154   :  { %v1281_v45 = vsub.f32 %v534_v25, %v1277_v55 }
 0x156   :  { %1285 = vst [vmem:[%s2239_s7 + $0x18] sm:$0xff] %v1281_v45 }
 0x157   :  { %1290 = vsyncpa [#allocation3], 1 }

// kernel: _lambda_.5
= control target key start
LH: loop header
LB: loop body
LE: loop exit
PB: predicated region body
PF: predicated region fallthrough
CT: control target
= control target key end

     0   :  { %12 = vsyncpa [#allocation3], 0  ;;  %s2688_s0 = inlined_call_operand.vmem [shape: f32[2], index: 0, kind: input, shape index: {}]   ;;  %s2689_s1 = inlined_call_operand.vmem [shape: f32[8,8], index: 1, kind: input, shape index: {}]   ;;  %s2690_s2 = inlined_call_operand.vmem [shape: f32[8,128], index: 2, kind: input, shape index: {}]   ;;  %s2691_s3 = inlined_call_operand.vmem [shape: f32[8,1], index: 3, kind: input, shape index: {}]   ;;  %s2692_s4 = inlined_call_operand.vmem [shape: f32[8,288], index: 4, kind: input, shape index: {}]   ;;  %s2693_s5 = inlined_call_operand.vmem [shape: f32[288,128], index: 5, kind: input, shape index: {}]   ;;  %s2694_s6 = inlined_call_operand.vmem [shape: f32[8,1], index: 6, kind: input, shape index: {}]   ;;  %s2695_s7 = inlined_call_operand.vmem [shape: f32[8,128], index: 7, kind: output, shape index: {}]  }
   0x1   :  { %s19_s26 = sshll.u32 %s2688_s0, 4  ;;  %s20_s26 = int_to_ptr.vmem [resolvable:$true] %s19_s26 }
   0x2   :  { %s2110_s27 = scalar_lea.vmem %s20_s26, 16  ;;  %p2115_p1 = scmp.lt.s32.totalorder %s20_s26, %s20_s26 }
   0x3   :  { %p2111_p0 = scmp.ne.s32.totalorder %s20_s26, %s2110_s27  ;;  %p2116_p2 = scmp.lt.s32.totalorder %s2110_s27, %s2110_s27 }
   0x5   :  { %p2117_p3 = por %p2116_p2, %p2115_p1 }
   0x7   :  { %p2118_p4 = pnand %p2117_p3, %p2111_p0 }
   0x9   :  { %2121 = shalt.err (!%p2118_p4)
}
   0xa   :  { %s2124_s28 = smov [#allocation2]  }
   0xb   :  { %22 = dma.vmem_to_smem %s20_s26, 16, %s2124_s28, [#allocation3]  }
   0xc   :  { %2122 = dma.done.wait [#allocation3], 16  }
   0xd   :  { %2123 = vsyncadd [#allocation3], 4294967280 }
   0xe   :  { %38 = sfence }
   0xf   :  { %v152_v0 = vld [vmem:[%s2693_s5 + $0x80] sm:$0xff]  ;;  %v153_v1 = vld [vmem:[%s2693_s5 + $0x88] sm:$0xff]  ;;  %v154_v7 = vld [vmem:[%s2693_s5 + $0x90] sm:$0xff]  ;;  %vm178_vm0 = vcmask 261120   ;;  %vm2128_vm1 = vmmov 0   ;;  %s1541_s14 = sld [smem:[#allocation2 + $0x1]] }
  0x10   :  { %v136_v2 = vld [vmem:[%s2693_s5] sm:$0xff]  ;;  %v231_v3 = vand.u32 4294901760, %v152_v0  ;;  %v234_v4 = vand.u32 4294901760, %v153_v1  ;;  %v137_v5 = vld [vmem:[%s2693_s5 + $0x8] sm:$0xff]  ;;  %v155_v8 = vld [vmem:[%s2693_s5 + $0x98] sm:$0xff]  ;;  %v237_v10 = vand.u32 4294901760, %v154_v7 }
  0x11   :  { %v183_v6 = vand.u32 4294901760, %v136_v2  ;;  %v186_v9 = vand.u32 4294901760, %v137_v5  ;;  %v240_v11 = vand.u32 4294901760, %v155_v8  ;;  %v138_v12 = vld [vmem:[%s2693_s5 + $0x10] sm:$0xff]  ;;  %v139_v17 = vld [vmem:[%s2693_s5 + $0x18] sm:$0xff]  ;;  %v156_v18 = vld [vmem:[%s2693_s5 + $0xa0] sm:$0xff] }
  0x12   :  { %v2200_v13 = vpack.c.bf16 %v234_v4, %v231_v3  ;;  %v2202_v14 = vsub.f32 %v152_v0, %v231_v3  ;;  %v2204_v15 = vsub.f32 %v153_v1, %v234_v4  ;;  %v2220_v22 = vsub.f32 %v154_v7, %v237_v10  ;;  %v157_v23 = vld [vmem:[%s2693_s5 + $0xa8] sm:$0xff]  ;;  %v140_v24 = vld [vmem:[%s2693_s5 + $0x20] sm:$0xff]  ;;  %v158_v33 = vld [vmem:[%s2693_s5 + $0xb0] sm:$0xff] }
  0x13   :  { %v2206_v16 = vsub.f32 %v136_v2, %v183_v6  ;;  %v2214_v19 = vpack.c.bf16 %v186_v9, %v183_v6  ;;  %v2216_v20 = vsub.f32 %v137_v5, %v186_v9  ;;  %v2218_v21 = vpack.c.bf16 %v240_v11, %v237_v10  ;;  %v141_v28 = vld [vmem:[%s2693_s5 + $0x28] sm:$0xff]  ;;  %v159_v38 = vld [vmem:[%s2693_s5 + $0xb8] sm:$0xff]  ;;  %v142_v43 = vld [vmem:[%s2693_s5 + $0x30] sm:$0xff] }
  0x14   :  { %1849 = vmatprep.subr.bf16.mxu1 %v2200_v13  ;;  %v1912_v25 = vpack.c.bf16 %v2204_v15, %v2202_v14  ;;  %v2231_v26 = vsub.f32 %v155_v8, %v240_v11  ;;  %v189_v27 = vand.u32 4294901760, %v138_v12  ;;  %v192_v31 = vand.u32 4294901760, %v139_v17  ;;  %v143_v44 = vld [vmem:[%s2693_s5 + $0x38] sm:$0xff]  ;;  %v160_v49 = vld [vmem:[%s2693_s5 + $0xc0] sm:$0xff]  ;;  %v161_v54 = vld [vmem:[%s2693_s5 + $0xc8] sm:$0xff] }
  0x15   :  { %1851 = vmatpush3.bf16.msra.mxu1 %v2214_v19  ;;  %v1914_v30 = vpack.c.bf16 %v2216_v20, %v2206_v16  ;;  %v243_v32 = vand.u32 4294901760, %v156_v18  ;;  %v246_v36 = vand.u32 4294901760, %v157_v23  ;;  %v195_v37 = vand.u32 4294901760, %v140_v24  ;;  %v144_v59 = vld [vmem:[%s2693_s5 + $0x40] sm:$0xff]  ;;  %v145_v60 = vld [vmem:[%s2693_s5 + $0x48] sm:$0xff]  ;;  %v162_v1 = vld [vmem:[%s2693_s5 + $0xd0] sm:$0xff] }
  0x16   :  { %1913 = vmatprep.subr.bf16.mxu0 %v1912_v25  ;;  %1853 = vmatprep.subr.bf16.mxu1 %v2218_v21  ;;  %v2244_v34 = vsub.f32 %v138_v12, %v189_v27  ;;  %v1916_v35 = vpack.c.bf16 %v2231_v26, %v2220_v22  ;;  %v2251_v39 = vpack.c.bf16 %v192_v31, %v189_v27  ;;  %v198_v42 = vand.u32 4294901760, %v141_v28  ;;  %v163_v6 = vld [vmem:[%s2693_s5 + $0xd8] sm:$0xff]  ;;  %v146_v11 = vld [vmem:[%s2693_s5 + $0x50] sm:$0xff]  ;;  %v164_v25 = vld [vmem:[%s2693_s5 + $0xe0] sm:$0xff] }
  0x17   :  { %1915 = vmatpush3.bf16.msra.mxu0 %v1914_v30  ;;  %v2253_v40 = vsub.f32 %v139_v17, %v192_v31  ;;  %v2255_v41 = vsub.f32 %v156_v18, %v243_v32  ;;  %v2263_v45 = vpack.c.bf16 %v246_v36, %v243_v32  ;;  %v2265_v46 = vsub.f32 %v157_v23, %v246_v36  ;;  %v147_v12 = vld [vmem:[%s2693_s5 + $0x58] sm:$0xff]  ;;  %v165_v32 = vld [vmem:[%s2693_s5 + $0xe8] sm:$0xff] }
  0x18   :  { %1917 = vmatprep.subr.bf16.mxu0 %v1916_v35  ;;  %v2267_v47 = vsub.f32 %v140_v24, %v195_v37  ;;  %v249_v48 = vand.u32 4294901760, %v158_v33  ;;  %v2275_v51 = vpack.c.bf16 %v198_v42, %v195_v37  ;;  %v2277_v52 = vsub.f32 %v141_v28, %v198_v42  ;;  %v149_v42 = vld [vmem:[%s2693_s5 + $0x68] sm:$0xff] }
  0x19   :  { %1855 = vmatpush3.bf16.msra.mxu1 %v2251_v39  ;;  %v1918_v50 = vpack.c.bf16 %v2253_v40, %v2244_v34  ;;  %v252_v53 = vand.u32 4294901760, %v159_v38  ;;  %v1920_v55 = vpack.c.bf16 %v2265_v46, %v2255_v41  ;;  %v201_v57 = vand.u32 4294901760, %v142_v43 }
  0x1a   :  { %1857 = vmatprep.subr.bf16.mxu1 %v2263_v45  ;;  %v2285_v56 = vsub.f32 %v158_v33, %v249_v48  ;;  %v204_v58 = vand.u32 4294901760, %v143_v44  ;;  %v1922_v61 = vpack.c.bf16 %v2277_v52, %v2267_v47  ;;  %v255_v0 = vand.u32 4294901760, %v160_v49 }
  0x1b   :  { %1919 = vmatpush3.bf16.msra.mxu0 %v1918_v50  ;;  %v2295_v62 = vpack.c.bf16 %v252_v53, %v249_v48  ;;  %v2297_v63 = vsub.f32 %v159_v38, %v252_v53  ;;  %v2304_v3 = vsub.f32 %v142_v43, %v201_v57  ;;  %v258_v5 = vand.u32 4294901760, %v161_v54  ;;  %v148_v38 = vld [vmem:[%s2693_s5 + $0x60] sm:$0xff]  ;;  %v166_v50 = vld [vmem:[%s2693_s5 + $0xf0] sm:$0xff] }
  0x1c   :  { %1921 = vmatprep.subr.bf16.mxu0 %v1920_v55  ;;  %v2302_v2 = vpack.c.bf16 %v204_v58, %v201_v57  ;;  %v2306_v4 = vsub.f32 %v143_v44, %v204_v58  ;;  %v2314_v8 = vsub.f32 %v160_v49, %v255_v0  ;;  %v207_v9 = vand.u32 4294901760, %v144_v59  ;;  %v167_v58 = vld [vmem:[%s2693_s5 + $0xf8] sm:$0xff] }
  0x1d   :  { %2716 = vst [vmem:[#allocation5_spill] sm:$0xff] %v2295_v62  ;;  %1859 = vmatpush3.bf16.msra.mxu1 %v2275_v51  ;;  %v1924_v7 = vpack.c.bf16 %v2297_v63, %v2285_v56  ;;  %v210_v10 = vand.u32 4294901760, %v145_v60  ;;  %v2324_v18 = vpack.c.bf16 %v258_v5, %v255_v0  ;;  %v2326_v23 = vsub.f32 %v161_v54, %v258_v5  ;;  %v151_v5 = vld [vmem:[%s2693_s5 + $0x78] sm:$0xff] }
  0x1e   :  { %2717 = vst [vmem:[#allocation6_spill] sm:$0xff] %v2302_v2  ;;  %1861 = vmatprep.subr.bf16.mxu1 %v2295_v62  ;;  %v261_v24 = vand.u32 4294901760, %v162_v1  ;;  %v1926_v27 = vpack.c.bf16 %v2306_v4, %v2304_v3  ;;  %v2333_v28 = vsub.f32 %v144_v59, %v207_v9  ;;  %v264_v31 = vand.u32 4294901760, %v163_v6 }
  0x1f   :  { %2718 = vst [vmem:[#allocation7_spill] sm:$0xff] %v2324_v18  ;;  %1923 = vmatpush3.bf16.msra.mxu0 %v1922_v61  ;;  %v2335_v30 = vsub.f32 %v145_v60, %v210_v10  ;;  %v1928_v33 = vpack.c.bf16 %v2326_v23, %v2314_v8  ;;  %v213_v36 = vand.u32 4294901760, %v146_v11  ;;  %v216_v37 = vand.u32 4294901760, %v147_v12 }
  0x20   :  { %1925 = vmatprep.subr.bf16.mxu0 %v1924_v7  ;;  %v2342_v35 = vsub.f32 %v162_v1, %v261_v24  ;;  %v2351_v43 = vpack.c.bf16 %v210_v10, %v207_v9  ;;  %v2355_v48 = vsub.f32 %v163_v6, %v264_v31  ;;  %v267_v49 = vand.u32 4294901760, %v164_v25  ;;  %v150_v1 = vld [vmem:[%s2693_s5 + $0x70] sm:$0xff] }
  0x21   :  { %1863 = vmatpush3.bf16.msra.mxu1 %v2302_v2  ;;  %v1930_v44 = vpack.c.bf16 %v2335_v30, %v2333_v28  ;;  %v2361_v53 = vpack.c.bf16 %v264_v31, %v261_v24  ;;  %v2363_v54 = vsub.f32 %v146_v11, %v213_v36  ;;  %v2365_v55 = vsub.f32 %v147_v12, %v216_v37  ;;  %v134_v11 = vld [vmem:[%s2692_s4 + $0x8] sm:$0xff]  ;;  %v133_v31 = vld [vmem:[%s2692_s4] sm:$0xff] }
  0x22   :  { %2719 = vst [vmem:[#allocation8_spill] sm:$0xff] %v2351_v43  ;;  %1865 = vmatprep.subr.bf16.mxu1 %v2324_v18  ;;  %v270_v57 = vand.u32 4294901760, %v165_v32  ;;  %v2370_v59 = vpack.c.bf16 %v216_v37, %v213_v36  ;;  %v2372_v60 = vsub.f32 %v164_v25, %v267_v49  ;;  %v219_v61 = vand.u32 4294901760, %v148_v38 }
  0x23   :  { %2720 = vst [vmem:[#allocation9_spill] sm:$0xff] %v2361_v53  ;;  %1927 = vmatpush3.bf16.msra.mxu0 %v1926_v27  ;;  %v222_v0 = vand.u32 4294901760, %v149_v42  ;;  %v1932_v6 = vpack.c.bf16 %v2355_v48, %v2342_v35  ;;  %v1934_v7 = vpack.c.bf16 %v2365_v55, %v2363_v54  ;;  %v273_v10 = vand.u32 4294901760, %v166_v50 }
  0x24   :  { %2721 = vst [vmem:[#allocation10_spill] sm:$0xff] %v2370_v59  ;;  %1929 = vmatprep.subr.bf16.mxu0 %v1928_v33  ;;  %v2384_v9 = vsub.f32 %v165_v32, %v270_v57  ;;  %v2390_v12 = vpack.c.bf16 %v270_v57, %v267_v49  ;;  %v2392_v24 = vsub.f32 %v148_v38, %v219_v61  ;;  %v276_v27 = vand.u32 4294901760, %v167_v58 }
  0x25   :  { %1867 = vmatpush3.bf16.msra.mxu1 %v2351_v43  ;;  %v2394_v25 = vsub.f32 %v149_v42, %v222_v0  ;;  %v2400_v32 = vpack.c.bf16 %v222_v0, %v219_v61  ;;  %v2402_v33 = vsub.f32 %v166_v50, %v273_v10  ;;  %v225_v36 = vand.u32 4294901760, %v150_v1 }
  0x26   :  { %2722 = vst [vmem:[#allocation11_spill] sm:$0xff] %v2390_v12  ;;  %1869 = vmatprep.subr.bf16.mxu1 %v2361_v53  ;;  %v228_v37 = vand.u32 4294901760, %v151_v5  ;;  %v1936_v38 = vpack.c.bf16 %v2384_v9, %v2372_v60  ;;  %v2408_v49 = vsub.f32 %v167_v58, %v276_v27  ;;  %v2410_v57 = vand.u32 4294901760, %v134_v11 }
  0x27   :  { %2723 = vst [vmem:[#allocation12_spill] sm:$0xff] %v2400_v32  ;;  %1931 = vmatpush3.bf16.msra.mxu0 %v1930_v44  ;;  %v1938_v42 = vpack.c.bf16 %v2394_v25, %v2392_v24  ;;  %v2412_v17 = vpack.c.bf16 %v276_v27, %v273_v10  ;;  %v2414_v61 = vsub.f32 %v150_v1, %v225_v36  ;;  %v2418_v0 = vand.u32 4294901760, %v133_v31 }
  0x28   :  { %1933 = vmatprep.subr.bf16.mxu0 %v1932_v6  ;;  %v2416_v50 = vsub.f32 %v151_v5, %v228_v37  ;;  %v2421_v44 = vpack.c.bf16 %v228_v37, %v225_v36  ;;  %v2424_v29 = vsub.f32 %v134_v11, %v2410_v57  ;;  %v409_v58 = vand.u32 4294901760, %v2202_v14 }
  0x29   :  { %2724 = vst [vmem:[#allocation13_spill] sm:$0xff] %v2412_v17  ;;  %1871 = vmatpush3.bf16.msra.mxu1 %v2370_v59  ;;  %v416_v53 = vand.u32 4294901760, %v2204_v15  ;;  %v1940_v1 = vpack.c.bf16 %v2408_v49, %v2402_v33  ;;  %v2432_v5 = vsub.f32 %v133_v31, %v2418_v0  ;;  %v2725_v6 = vand.u32 4294901760, %v2206_v16 }
  0x2a   :  { %1873 = vmatprep.subr.bf16.mxu1 %v2390_v12  ;;  %v2726_v27 = vand.u32 4294901760, %v2216_v20  ;;  %v2708_v36 = vand.u32 4294901760, %v2424_v29  ;;  %v1942_v37 = vpack.c.bf16 %v2416_v50, %v2414_v61  ;;  %v410_v12 = vsub.f32 %v2202_v14, %v409_v58  ;;  %656 = vmatprep.mubr.f32.mxu0 %v2424_v29 }
  0x2b   :  { %v298_v10 = vsub.f32 %v2206_v16, %v2725_v6  ;;  %1935 = vmatpush3.bf16.msra.mxu0 %v1934_v7  ;;  %v417_v59 = vsub.f32 %v2204_v15, %v416_v53  ;;  %v2715_v31 = vand.u32 4294901760, %v2432_v5  ;;  %v1976_v18 = vpack.c.bf16 %v416_v53, %v409_v58 }
  0x2c   :  { %v305_v11 = vsub.f32 %v2216_v20, %v2726_v27  ;;  %1937 = vmatprep.subr.bf16.mxu0 %v1936_v38  ;;  %v281_v7 = vsub.f32 %v2424_v29, %v2708_v36  ;;  %v411_v27 = vand.u32 4294901760, %v410_v12  ;;  %v423_v14 = vand.u32 4294901760, %v2220_v22 }
  0x2d   :  { %v299_v6 = vand.u32 4294901760, %v298_v10  ;;  %1875 = vmatpush3.bf16.msra.mxu1 %v2400_v32  ;;  %v418_v2 = vand.u32 4294901760, %v417_v59  ;;  %v287_v15 = vsub.f32 %v2432_v5, %v2715_v31  ;;  %v2727_v38 = vand.u32 4294901760, %v2206_v16 }
  0x2e   :  { %v306_v43 = vand.u32 4294901760, %v305_v11  ;;  %1877 = vmatprep.subr.bf16.mxu1 %v2412_v17  ;;  %v2728_v53 = vand.u32 4294901760, %v2216_v20  ;;  %v430_v10 = vand.u32 4294901760, %v2231_v26  ;;  %v311_v11 = vand.u32 4294901760, %v2244_v34 }
  0x2f   :  { %1939 = vmatpush3.bf16.msra.mxu0 %v1938_v42  ;;  %v282_v12 = vand.u32 4294901760, %v281_v7  ;;  %v1880_v59 = vpack.c.bf16 %v418_v2, %v411_v27  ;;  %v424_v36 = vsub.f32 %v2220_v22, %v423_v14  ;;  %v318_v17 = vand.u32 4294901760, %v2253_v40 }
  0x30   :  { %v1978_v58 = vpack.c.bf16 %v2728_v53, %v2727_v38  ;;  %1941 = vmatprep.subr.bf16.mxu0 %v1940_v1  ;;  %v288_v32 = vand.u32 4294901760, %v287_v15  ;;  %v1882_v62 = vpack.c.bf16 %v306_v43, %v299_v6  ;;  %v431_v31 = vsub.f32 %v2231_v26, %v430_v10 }
  0x31   :  { %v312_v16 = vsub.f32 %v2244_v34, %v311_v11  ;;  %1879 = vmatpush3.bf16.msra.mxu1 %v2421_v44  ;;  %283 = vmatprep.mubr.f32.mxu1 %v282_v12  ;;  %v425_v20 = vand.u32 4294901760, %v424_v36  ;;  %v319_v38 = vsub.f32 %v2253_v40, %v318_v17  ;;  %v1980_v42 = vpack.c.bf16 %v430_v10, %v423_v14 }
  0x32   :  { %v437_v2 = vand.u32 4294901760, %v2255_v41  ;;  %1881 = vmatprep.subr.bf16.mxu1 %v1880_v59  ;;  %v432_v22 = vand.u32 4294901760, %v431_v31  ;;  %v444_v1 = vand.u32 4294901760, %v2265_v46  ;;  %v325_v43 = vand.u32 4294901760, %v2267_v47 }
  0x33   :  { %v313_v7 = vand.u32 4294901760, %v312_v16  ;;  %1943 = vmatpush3.bf16.msra.mxu0 %v1942_v37  ;;  %v320_v26 = vand.u32 4294901760, %v319_v38  ;;  %v332_v6 = vand.u32 4294901760, %v2277_v52  ;;  %v451_v36 = vand.u32 4294901760, %v2285_v56 }
  0x34   :  { %v438_v34 = vsub.f32 %v2255_v41, %v437_v2  ;;  %289 = vmatmul.mubr.f32.vlgmr.msra.gmra.mrb[0].mxu1 %v288_v32  ;;  %1977 = vmatprep.subr.bf16.mxu0 %v1976_v18  ;;  %v1884_v40 = vpack.c.bf16 %v432_v22, %v425_v20  ;;  %v445_v27 = vsub.f32 %v2265_v46, %v444_v1  ;;  %v458_v14 = vand.u32 4294901760, %v2297_v63 }
  0x35   :  { %v326_v31 = vsub.f32 %v2267_v47, %v325_v43  ;;  %1883 = vmatpush3.bf16.msra.mxu1 %v1882_v62  ;;  %v1886_v15 = vpack.c.bf16 %v320_v26, %v313_v7  ;;  %v1982_v53 = vpack.c.bf16 %v318_v17, %v311_v11  ;;  %v333_v10 = vsub.f32 %v2277_v52, %v332_v6 }
  0x36   :  { %v439_v37 = vand.u32 4294901760, %v438_v34  ;;  %519 = vmatprep.mubr.f32.mxu1 %v2410_v57  ;;  %659 = vmatmul.mubr.f32.vlgmr.msra.gmra.mrb[0].mxu0 %v2432_v5  ;;  %v446_v41 = vand.u32 4294901760, %v445_v27  ;;  %v1984_v32 = vpack.c.bf16 %v444_v1, %v437_v2  ;;  %v452_v46 = vsub.f32 %v2285_v56, %v451_v36 }
  0x37   :  { %1885 = vmatprep.subr.bf16.mxu1 %v1884_v40  ;;  %v327_v18 = vand.u32 4294901760, %v326_v31  ;;  %1979 = vmatpush3.bf16.msra.mxu0 %v1978_v58  ;;  %v334_v47 = vand.u32 4294901760, %v333_v10  ;;  %v459_v12 = vsub.f32 %v2297_v63, %v458_v14  ;;  %v339_v62 = vand.u32 4294901760, %v2304_v3 }
  0x38   :  { %v346_v17 = vand.u32 4294901760, %v2306_v4  ;;  %933 = vmatprep.mubr.f32.mxu0 %v2410_v57  ;;  %1981 = vmatprep.subr.bf16.mxu0 %v1980_v42  ;;  %v1888_v52 = vpack.c.bf16 %v446_v41, %v439_v37  ;;  %v1986_v11 = vpack.c.bf16 %v332_v6, %v325_v43  ;;  %v453_v59 = vand.u32 4294901760, %v452_v46 }
  0x39   :  { %v465_v16 = vand.u32 4294901760, %v2314_v8  ;;  %1887 = vmatpush3.bf16.msra.mxu1 %v1886_v15  ;;  %v1890_v20 = vpack.c.bf16 %v334_v47, %v327_v18  ;;  %v460_v38 = vand.u32 4294901760, %v459_v12  ;;  %v340_v56 = vsub.f32 %v2304_v3, %v339_v62 }
  0x3a   :  { %v347_v58 = vsub.f32 %v2306_v4, %v346_v17  ;;  %1889 = vmatprep.subr.bf16.mxu1 %v1888_v52  ;;  %v1988_v63 = vpack.c.bf16 %v458_v14, %v451_v36  ;;  %v472_v22 = vand.u32 4294901760, %v2326_v23  ;;  %v353_v42 = vand.u32 4294901760, %v2333_v28 }
  0x3b   :  { %v466_v2 = vsub.f32 %v2314_v8, %v465_v16  ;;  %1983 = vmatpush3.bf16.msra.mxu0 %v1982_v53  ;;  %v1892_v7 = vpack.c.bf16 %v460_v38, %v453_v59  ;;  %v341_v1 = vand.u32 4294901760, %v340_v56  ;;  %v360_v26 = vand.u32 4294901760, %v2335_v30 }
  0x3c   :  { %v348_v43 = vand.u32 4294901760, %v347_v58  ;;  %1985 = vmatprep.subr.bf16.mxu0 %v1984_v32  ;;  %v1990_v34 = vpack.c.bf16 %v346_v17, %v339_v62  ;;  %v473_v3 = vsub.f32 %v2326_v23, %v472_v22  ;;  %v354_v4 = vsub.f32 %v2333_v28, %v353_v42 }
  0x3d   :  { %v467_v6 = vand.u32 4294901760, %v466_v2  ;;  %1891 = vmatpush3.bf16.msra.mxu1 %v1890_v20  ;;  %v361_v8 = vsub.f32 %v2335_v30, %v360_v26  ;;  %v1992_v40 = vpack.c.bf16 %v472_v22, %v465_v16  ;;  %v479_v27 = vand.u32 4294901760, %v2342_v35 }
  0x3e   :  { %v1894_v36 = vpack.c.bf16 %v348_v43, %v341_v1  ;;  %1893 = vmatprep.subr.bf16.mxu1 %v1892_v7  ;;  %v474_v31 = vand.u32 4294901760, %v473_v3  ;;  %v355_v14 = vand.u32 4294901760, %v354_v4  ;;  %v486_v15 = vand.u32 4294901760, %v2355_v48 }
  0x3f   :  { %v367_v53 = vand.u32 4294901760, %v2363_v54  ;;  %1987 = vmatpush3.bf16.msra.mxu0 %v1986_v11  ;;  %v362_v37 = vand.u32 4294901760, %v361_v8  ;;  %v480_v23 = vsub.f32 %v2342_v35, %v479_v27  ;;  %v374_v28 = vand.u32 4294901760, %v2365_v55  ;;  %v171_v8 = vld [vmem:[%s2693_s5 + $0x118] sm:$0xff] }
  0x40   :  { %v493_v10 = vand.u32 4294901760, %v2372_v60  ;;  %1989 = vmatprep.subr.bf16.mxu0 %v1988_v63  ;;  %v1896_v30 = vpack.c.bf16 %v474_v31, %v467_v6  ;;  %v1994_v41 = vpack.c.bf16 %v360_v26, %v353_v42  ;;  %v487_v18 = vsub.f32 %v2355_v48, %v486_v15 }
  0x41   :  { %v368_v32 = vsub.f32 %v2363_v54, %v367_v53  ;;  %1895 = vmatpush3.bf16.msra.mxu1 %v1894_v36  ;;  %v1898_v46 = vpack.c.bf16 %v362_v37, %v355_v14  ;;  %v481_v47 = vand.u32 4294901760, %v480_v23  ;;  %v375_v12 = vsub.f32 %v2365_v55, %v374_v28  ;;  %v170_v36 = vld [vmem:[%s2693_s5 + $0x110] sm:$0xff] }
  0x42   :  { %v1996_v62 = vpack.c.bf16 %v486_v15, %v479_v27  ;;  %1897 = vmatprep.subr.bf16.mxu1 %v1896_v30  ;;  %v488_v17 = vand.u32 4294901760, %v487_v18  ;;  %v494_v52 = vsub.f32 %v2372_v60, %v493_v10  ;;  %v500_v11 = vand.u32 4294901760, %v2384_v9  ;;  %v168_v60 = vld [vmem:[%s2693_s5 + $0x100] sm:$0xff]  ;;  %v135_v14 = vld [vmem:[%s2692_s4 + $0x10] sm:$0xff] }
  0x43   :  { %v369_v35 = vand.u32 4294901760, %v368_v32  ;;  %1991 = vmatpush3.bf16.msra.mxu0 %v1990_v34  ;;  %v376_v59 = vand.u32 4294901760, %v375_v12  ;;  %v381_v16 = vand.u32 4294901760, %v2392_v24  ;;  %v388_v48 = vand.u32 4294901760, %v2394_v25 }
  0x44   :  { %v507_v54 = vand.u32 4294901760, %v2402_v33  ;;  %1993 = vmatprep.subr.bf16.mxu0 %v1992_v40  ;;  %v1900_v20 = vpack.c.bf16 %v488_v17, %v481_v47  ;;  %v1998_v38 = vpack.c.bf16 %v374_v28, %v367_v53  ;;  %v495_v55 = vand.u32 4294901760, %v494_v52 }
  0x45   :  { %v501_v56 = vsub.f32 %v2384_v9, %v500_v11  ;;  %1899 = vmatpush3.bf16.msra.mxu1 %v1898_v46  ;;  %v1902_v58 = vpack.c.bf16 %v376_v59, %v369_v35  ;;  %v382_v63 = vsub.f32 %v2392_v24, %v381_v16  ;;  %v389_v2 = vsub.f32 %v2394_v25, %v388_v48  ;;  %v169_v24 = vld [vmem:[%s2693_s5 + $0x108] sm:$0xff]  ;;  %v2549_v35 = vld [vmem:[%s2689_s1] sm:$0xff] }
  0x46   :  { %v2000_v22 = vpack.c.bf16 %v500_v11, %v493_v10  ;;  %1901 = vmatprep.subr.bf16.mxu1 %v1900_v20  ;;  %v508_v7 = vsub.f32 %v2402_v33, %v507_v54  ;;  %v514_v1 = vand.u32 4294901760, %v2408_v49  ;;  %v395_v43 = vand.u32 4294901760, %v2414_v61 }
  0x47   :  { %v502_v42 = vand.u32 4294901760, %v501_v56  ;;  %1995 = vmatpush3.bf16.msra.mxu0 %v1994_v41  ;;  %v383_v9 = vand.u32 4294901760, %v382_v63  ;;  %v390_v26 = vand.u32 4294901760, %v389_v2  ;;  %v402_v34 = vand.u32 4294901760, %v2416_v50 }
  0x48   :  { %v1045_v6 = vand.u32 4294901760, %v168_v60  ;;  %1997 = vmatprep.subr.bf16.mxu0 %v1996_v62  ;;  %v509_v3 = vand.u32 4294901760, %v508_v7  ;;  %v515_v4 = vsub.f32 %v2408_v49, %v514_v1  ;;  %v396_v33 = vsub.f32 %v2414_v61, %v395_v43 }
  0x49   :  { %v1904_v25 = vpack.c.bf16 %v502_v42, %v495_v55  ;;  %1903 = vmatpush3.bf16.msra.mxu1 %v1902_v58  ;;  %v1906_v40 = vpack.c.bf16 %v390_v26, %v383_v9  ;;  %v2002_v27 = vpack.c.bf16 %v388_v48, %v381_v16  ;;  %v403_v31 = vsub.f32 %v2416_v50, %v402_v34 }
  0x4a   :  { %v516_v49 = vand.u32 4294901760, %v515_v4  ;;  %v397_v61 = vand.u32 4294901760, %v396_v33  ;;  %v1048_v15 = vand.u32 4294901760, %v169_v24  ;;  %v2534_v53 = vsub.f32 %v168_v60, %v1045_v6  ;;  %v2732_v33 = vld [vmem:[#allocation7_spill] sm:$0xff] }
  0x4b   :  { %1905 = vmatprep.subr.bf16.mxu1 %v1904_v25  ;;  %1999 = vmatpush3.bf16.msra.mxu0 %v1998_v38  ;;  %v404_v37 = vand.u32 4294901760, %v403_v31  ;;  %v1051_v23 = vand.u32 4294901760, %v170_v36  ;;  %v1054_v28 = vand.u32 4294901760, %v171_v8  ;;  %v2004_v30 = vpack.c.bf16 %v514_v1, %v507_v54 }
  0x4c   :  { %2001 = vmatprep.subr.bf16.mxu0 %v2000_v22  ;;  %v1908_v10 = vpack.c.bf16 %v516_v49, %v509_v3  ;;  %v2536_v41 = vsub.f32 %v169_v24, %v1048_v15  ;;  %v180_v50 = vsel %vm178_vm0, %v135_v14, 0  ;;  %v2006_v32 = vpack.c.bf16 %v402_v34, %v395_v43  ;;  %v172_v24 = vld [vmem:[%s2694_s6] sm:$0xff]  ;;  %v2731_v3 = vld [vmem:[#allocation6_spill] sm:$0xff] }
  0x4d   :  { %1907 = vmatpush3.bf16.msra.mxu1 %v1906_v40  ;;  %v1910_v18 = vpack.c.bf16 %v404_v37, %v397_v61  ;;  %v2538_v46 = vsub.f32 %v170_v36, %v1051_v23  ;;  %v2540_v47 = vand.u32 4294901760, %v180_v50  ;;  %v2542_v12 = vsub.f32 %v171_v8, %v1054_v28  ;;  %v2733_v40 = vld [vmem:[#allocation8_spill] sm:$0xff]  ;;  %v2735_v49 = vld [vmem:[#allocation10_spill] sm:$0xff]  ;;  %v2736_v61 = vld [vmem:[#allocation11_spill] sm:$0xff] }
  0x4e   :  { %1909 = vmatprep.subr.bf16.mxu1 %v1908_v10  ;;  %v1126_v62 = vand.u32 4294901760, %v2534_v53  ;;  %v1133_v17 = vand.u32 4294901760, %v2536_v41  ;;  %v2125_v11 = vmov 2   ;;  %v2555_v59 = vpack.c.bf16 %v1048_v15, %v1045_v6  ;;  %v2730_v6 = vld [vmem:[#allocation5_spill] sm:$0xff]  ;;  %v2737_v37 = vld [vmem:[#allocation12_spill] sm:$0xff] }
  0x4f   :  { %2003 = vmatpush3.bf16.msra.mxu0 %v2002_v27  ;;  %v2552_v52 = vsub.f32 %v180_v50, %v2540_v47  ;;  %2101 = vset.pattern.permute.xlu1 %v2125_v11  ;;  %v1140_v20 = vand.u32 4294901760, %v2538_v46  ;;  %v1147_v38 = vand.u32 4294901760, %v2542_v12  ;;  %v2126_v55 = vmov 0   ;;  %v2734_v27 = vld [vmem:[#allocation9_spill] sm:$0xff] }
  0x50   :  { %2005 = vmatprep.subr.bf16.mxu0 %v2004_v30  ;;  %62 = vperm.xlu1 %2101, %v2549_v35   ;;  %v1127_v48 = vsub.f32 %v2534_v53, %v1126_v62  ;;  %v1134_v54 = vsub.f32 %v2536_v41, %v1133_v17  ;;  %v2127_v56 = vmov 0.0|0.0   ;;  %v2729_v60 = vand.u32 4294901760, %v2424_v29  ;;  %v121_v10 = vld [vmem:[%s2691_s3] sm:$0xff] }
  0x51   :  { %1911 = vmatpush3.bf16.msra.mxu1 %v1910_v18  ;;  %v1115_v16 = vand.u32 4294901760, %v2552_v52  ;;  %2099 = vset.pattern.permute.xlu0 %v2126_v55  ;;  %v2575_v58 = vpack.c.bf16 %v1054_v28, %v1051_v23  ;;  %v2129_v2 = vmov 0.0   ;;  %v1141_v42 = vsub.f32 %v2538_v46, %v1140_v20  ;;  %v2738_v28 = vld [vmem:[#allocation13_spill] sm:$0xff] }
  0x52   :  { %1945 = vmatprep.subr.bf16.mxu1 %v2200_v13  ;;  %v1128_v22 = vand.u32 4294901760, %v1127_v48  ;;  %v1135_v29 = vand.u32 4294901760, %v1134_v54  ;;  %v1148_v7 = vsub.f32 %v2542_v12, %v1147_v38  ;;  %v2130_v1 = vmov 3   ;;  %43 = vperm.xlu0 %2099, %v2549_v35   ;;  %v40_v48 = vld [vmem:[%s2690_s2] sm:$0xff]  ;;  %s129_s2 = sld [smem:[#allocation2]] }
  0x53   :  { %2007 = vmatpush3.bf16.msra.mxu0 %v2006_v32  ;;  %v1116_v63 = vsub.f32 %v2552_v52, %v1115_v16  ;;  %v1142_v26 = vand.u32 4294901760, %v1141_v42  ;;  %v2131_v4 = vmov 1   ;;  %v2053_v36 = vpack.c.bf16 %v2536_v41, %v2534_v53 }
  0x54   :  { %521 = vmatmul.mubr.f32.vlgmr.msra.gmra.mrb[2].mxu1 %v2418_v0  ;;  %2040 = vmatprep.subr.bf16.mxu0 %v2127_v56  ;;  %v2047_v9 = vpack.c.bf16 %v1135_v29, %v1128_v22  ;;  %v1149_v34 = vand.u32 4294901760, %v1148_v7  ;;  %v2132_v8 = vmov 5   ;;  %v2056_v31 = vpack.c.bf16 %v2542_v12, %v2538_v46 }
  0x55   :  { %1947 = vmatpush3.bf16.msra.mxu1 %v2214_v19  ;;  %763 = vmatprep.mubr.f32.mxu1 %v2729_v60  ;;  %v1117_v43 = vand.u32 4294901760, %v1116_v63  ;;  %v2133_v14 = vmov 4   ;;  %v2134_v15 = vmov 6   ;;  %v2135_v23 = vmov 7  }
  0x56   :  { %935 = vmatmul.mubr.f32.vlgmr.msra.gmra.mrb[2].mxu0 %v2418_v0  ;;  %1949 = vmatprep.subr.bf16.mxu1 %v2218_v21  ;;  %v2050_v25 = vpack.c.bf16 %v1149_v34, %v1142_v26  ;;  %v2065_v30 = vpack.c.bf16 %v1133_v17, %v1126_v62  ;;  %v2739_v50 = vand.u32 4294901760, %v2432_v5 }
  0x57   :  { %2042 = vmatpush3.bf16.msra.mxu0 %v2555_v59  ;;  %1790 = vmatprep.mubr.msk.f32.mxu0 %vm2128_vm1, %v2129_v2 }
  0x58   :  { %2043 = vmatprep.subr.bf16.mxu0 %v2127_v56  ;;  %2102 = vset.pattern.permute.xlu1 %v2130_v1 }
  0x59   :  { %1951 = vmatpush3.bf16.msra.mxu1 %v2251_v39  ;;  %72 = vperm.xlu1 %2102, %v2549_v35  }
  0x5a   :  { %1953 = vmatprep.subr.bf16.mxu1 %v2263_v45  ;;  %2100 = vset.pattern.permute.xlu0 %v2131_v4 }
  0x5b   :  { %2045 = vmatpush3.bf16.msra.mxu0 %v2575_v58  ;;  %52 = vperm.xlu0 %2100, %v2549_v35  }
  0x5c   :  { %2046 = vmatprep.subr.bf16.mxu0 %v2127_v56 }
  0x5d   :  { %1955 = vmatpush3.bf16.msra.mxu1 %v2275_v51  ;;  %2103 = vset.pattern.permute.xlu1 %v2126_v55 }
  0x5e   :  { %1791 = vmatmul.mubr.f32.vlgmr.msra.gmra.mrb[4].mxu0 %v1117_v43  ;;  %1957 = vmatprep.subr.bf16.mxu1 %v2730_v6 }
  0x5f   :  { %2048 = vmatpush3.bf16.msra.mxu0 %v2047_v9  ;;  %1801 = vmatprep.mubr.msk.f32.mxu0 %vm2128_vm1, %v2129_v2 }
  0x60   :  { %2049 = vmatprep.subr.bf16.mxu0 %v2127_v56  ;;  %175 = vperm.xlu1 %2103, %v172_v24  }
  0x61   :  { %1959 = vmatpush3.bf16.msra.mxu1 %v2731_v3  ;;  %2104 = vset.pattern.permute.xlu0 %v2133_v14 }
  0x62   :  { %1961 = vmatprep.subr.bf16.mxu1 %v2732_v33  ;;  %82 = vperm.xlu0 %2104, %v2549_v35  }
  0x63   :  { %2051 = vmatpush3.bf16.msra.mxu0 %v2050_v25 }
  0x64   :  { %2052 = vmatprep.subr.bf16.mxu0 %v2127_v56  ;;  %2105 = vset.pattern.permute.xlu1 %v2132_v8 }
  0x65   :  { %1963 = vmatpush3.bf16.msra.mxu1 %v2733_v40  ;;  %92 = vperm.xlu1 %2105, %v2549_v35  }
  0x66   :  { %1802 = vmatmul.mubr.f32.vlgmr.msra.gmra.mrb[4].mxu0 %v2540_v47  ;;  %1965 = vmatprep.subr.bf16.mxu1 %v2734_v27 }
  0x67   :  { %2054 = vmatpush3.bf16.msra.mxu0 %v2053_v36  ;;  %1812 = vmatprep.mubr.msk.f32.mxu0 %vm2128_vm1, %v2129_v2 }
  0x68   :  { %2055 = vmatprep.subr.bf16.mxu0 %v2127_v56  ;;  %2107 = vset.pattern.permute.xlu0 %v2135_v23 }
  0x69   :  { %1967 = vmatpush3.bf16.msra.mxu1 %v2735_v49  ;;  %2106 = vset.pattern.permute.xlu1 %v2134_v15 }
  0x6a   :  { %1969 = vmatprep.subr.bf16.mxu1 %v2736_v61  ;;  %102 = vperm.xlu1 %2106, %v2549_v35  }
  0x6b   :  { %2057 = vmatpush3.bf16.msra.mxu0 %v2056_v31  ;;  %112 = vperm.xlu0 %2107, %v2549_v35  }
  0x6c   :  { %2058 = vmatprep.subr.bf16.mxu0 %v2127_v56 }
  0x6d   :  { %1971 = vmatpush3.bf16.msra.mxu1 %v2737_v37 }
  0x6e   :  { %1813 = vmatmul.mubr.f32.vlgmr.msra.gmra.mrb[4].mxu0 %v2552_v52  ;;  %1973 = vmatprep.subr.bf16.mxu1 %v2738_v28  ;;  %v46_v52 = vlaneseq }
  0x6f   :  { %2060 = vmatpush3.bf16.msra.mxu0 %v2555_v59  ;;  %1823 = vmatprep.mubr.msk.f32.mxu0 %vm2128_vm1, %v2129_v2 }
  0x70   :  { %2061 = vmatprep.subr.bf16.mxu0 %v2127_v56  ;;  %2108 = vset.pattern.permute.xlu1 %v2126_v55 }
  0x71   :  { %1975 = vmatpush3.bf16.msra.mxu1 %v2421_v44  ;;  %124 = vperm.xlu1 %2108, %v121_v10  }
  0x72   :  { %2009 = vmatprep.subr.bf16.mxu1 %v2200_v13  ;;  %v2068_v13 = vpack.c.bf16 %v1147_v38, %v1140_v20  ;;  %2109 = vset.pattern.permute.xlu0 %v2126_v55 }
  0x73   :  { %2063 = vmatpush3.bf16.msra.mxu0 %v2575_v58 }
  0x74   :  { %767 = vmatmul.mubr.f32.vlgmr.msra.gmra.mrb[4].mxu1 %v2739_v50  ;;  %2064 = vmatprep.subr.bf16.mxu0 %v2127_v56 }
  0x75   :  { %2011 = vmatpush3.bf16.msra.mxu1 %v2214_v19  ;;  %1037 = vmatprep.mubr.f32.mxu1 %v2410_v57 }
  0x76   :  { %1824 = vmatmul.mubr.f32.vlgmr.msra.gmra.mrb[4].mxu0 %v1115_v16  ;;  %2013 = vmatprep.subr.bf16.mxu1 %v2218_v21 }
  0x77   :  { %2066 = vmatpush3.bf16.msra.mxu0 %v2065_v30  ;;  %1834 = vmatprep.mubr.msk.f32.mxu0 %vm2128_vm1, %v2129_v2 }
  0x78   :  { %2067 = vmatprep.subr.bf16.mxu0 %v2127_v56 }
  0x79   :  { %2015 = vmatpush3.bf16.msra.mxu1 %v2251_v39 }
  0x7a   :  { %2017 = vmatprep.subr.bf16.mxu1 %v2263_v45 }
  0x7b   :  { %2069 = vmatpush3.bf16.msra.mxu0 %v2068_v13 }
  0x7c   :  { %2070 = vmatprep.subr.bf16.mxu0 %v2127_v56 }
  0x7d   :  { %2019 = vmatpush3.bf16.msra.mxu1 %v2275_v51 }
  0x7e   :  { %1835 = vmatmul.mubr.f32.vlgmr.msra.gmra.mrb[4].mxu0 %v2540_v47  ;;  %2021 = vmatprep.subr.bf16.mxu1 %v2730_v6 }
  0x7f   :  { %2072 = vmatpush3.bf16.msra.mxu0 %v2555_v59  ;;  %1845 = vmatprep.mubr.msk.f32.mxu0 %vm2128_vm1, %v2129_v2 }
  0x80   :  { %2073 = vmatprep.subr.bf16.mxu0 %v2127_v56 }
  0x81   :  { %2023 = vmatpush3.bf16.msra.mxu1 %v2731_v3 }
  0x82   :  { %2025 = vmatprep.subr.bf16.mxu1 %v2732_v33 }
  0x83   :  { %2075 = vmatpush3.bf16.msra.mxu0 %v2575_v58 }
  0x85   :  { %2027 = vmatpush3.bf16.msra.mxu1 %v2733_v40 }
  0x86   :  { %1846 = vmatmul.mubr.f32.vlgmr.msra.gmra.mrb[4].mxu0 %v2540_v47  ;;  %2029 = vmatprep.subr.bf16.mxu1 %v2734_v27 }
  0x89   :  { %2031 = vmatpush3.bf16.msra.mxu1 %v2735_v49 }
  0x8a   :  { %2033 = vmatprep.subr.bf16.mxu1 %v2736_v61 }
  0x8d   :  { %2035 = vmatpush3.bf16.msra.mxu1 %v2737_v37 }
  0x8e   :  { %2037 = vmatprep.subr.bf16.mxu1 %v2738_v28 }
  0x91   :  { %2039 = vmatpush3.bf16.msra.mxu1 %v2421_v44 }
  0x94   :  { %1039 = vmatmul.mubr.f32.vlgmr.msra.gmra.mrb[6].mxu1 %v2418_v0  ;;  %v47_v0 = vshrl.u32 %v46_v52, 7 }
  0x96   :  { %v48_v59 = vsub.s32 0, %v47_v0  ;;  %v57_v16 = vsub.s32 1, %v47_v0  ;;  %v67_v54 = vsub.s32 2, %v47_v0  ;;  %v77_v60 = vsub.s32 3, %v47_v0 }
  0x97   :  { %v87_v9 = vsub.s32 4, %v47_v0  ;;  %v97_v6 = vsub.s32 5, %v47_v0  ;;  %v107_v40 = vsub.s32 6, %v47_v0  ;;  %v117_v61 = vsub.s32 7, %v47_v0 }
  0x98   :  { %v49_v20 = vrot.slane %v40_v48, %v48_v59  ;;  %v58_v38 = vrot.slane %v40_v48, %v57_v16  ;;  %v68_v63 = vrot.slane %v40_v48, %v67_v54  ;;  %v78_v7 = vrot.slane %v40_v48, %v77_v60 }
  0x99   :  { %v88_v25 = vrot.slane %v40_v48, %v87_v9  ;;  %v98_v33 = vrot.slane %v40_v48, %v97_v6  ;;  %v108_v14 = vrot.slane %v40_v48, %v107_v40  ;;  %v118_v10 = vrot.slane %v40_v48, %v117_v61 }
  0xcf   :  { %v63_v5 = vpop.permute.xlu1 %62 }
  0xd0   :  { %v69_v1 = vmul.f32 %v68_v63, %v63_v5  ;;  %v130_v5 = vstv %s129_s2 }
  0xd1   :  { %v44_v11 = vpop.permute.xlu0 %43 }
  0xd2   :  { %v50_v22 = vmul.f32 %v49_v20, %v44_v11 }
  0xd8   :  { %v73_v53 = vpop.permute.xlu1 %72 }
  0xd9   :  { %v79_v34 = vmul.f32 %v78_v7, %v73_v53 }
  0xda   :  { %v53_v55 = vpop.permute.xlu0 %52 }
  0xdb   :  { %v59_v29 = vmul.f32 %v58_v38, %v53_v55 }
  0xdd   :  { %v60_v43 = vadd.f32 %v59_v29, %v50_v22 }
  0xdf   :  { %v176_v41 = vpop.permute.xlu1 %175  ;;  %v70_v24 = vadd.f32 %v69_v1, %v60_v43 }
  0xe1   :  { %v83_v3 = vpop.permute.xlu0 %82  ;;  %v80_v36 = vadd.f32 %v79_v34, %v70_v24 }
  0xe2   :  { %v89_v8 = vmul.f32 %v88_v25, %v83_v3 }
  0xe4   :  { %v93_v4 = vpop.permute.xlu1 %92  ;;  %v90_v31 = vadd.f32 %v89_v8, %v80_v36 }
  0xe5   :  { %v99_v27 = vmul.f32 %v98_v33, %v93_v4 }
  0xe7   :  { %v100_v23 = vadd.f32 %v99_v27, %v90_v31 }
  0xe9   :  { %v103_v15 = vpop.permute.xlu1 %102 }
  0xea   :  { %v109_v28 = vmul.f32 %v108_v14, %v103_v15  ;;  %v113_v30 = vpop.permute.xlu0 %112 }
  0xeb   :  { %v119_v13 = vmul.f32 %v118_v10, %v113_v30 }
  0xec   :  { %v110_v50 = vadd.f32 %v109_v28, %v100_v23 }
 0x107   :  { %v1574_v19 = vpop.f32.mrb[0].mxu1 }
 0x108   :  { %v1575_v21 = vpop.f32.mrb[1].mxu1 }
 0x109   :  { %v1576_v39 = vadd.f32 %v1575_v21, %v1574_v19  ;;  %v1644_v45 = vpop.f32.mrb[0].mxu0  ;;  %v120_v19 = vadd.f32 %v119_v13, %v110_v50  ;;  %v125_v21 = vpop.permute.xlu1 %124 }
 0x10a   :  { %v1645_v51 = vpop.f32.mrb[1].mxu0 }
 0x10b   :  { %v1646_v57 = vadd.f32 %v1645_v51, %v1644_v45  ;;  %v291_v46 = vadd.f32 %v1576_v39, %v176_v41  ;;  %v127_v51 = vadd.f32 %v125_v21, %v120_v19  ;;  %v1531_v41 = vstv %s1541_s14 }
 0x10d   :  { %vm128_vm2 = vcmp.ge.f32.partialorder %v127_v51, 0.0 }
 0x127   :  { %v1609_v18 = vpop.f32.mrb[2].mxu1 }
 0x128   :  { %v1610_v32 = vpop.f32.mrb[3].mxu1 }
 0x129   :  { %v1611_v47 = vadd.f32 %v1610_v32, %v1609_v18  ;;  %v1714_v12 = vpop.f32.mrb[2].mxu0  ;;  %v131_v18 = vmul.f32 %v130_v5, %v127_v51 }
 0x12a   :  { %v1715_v62 = vpop.f32.mrb[3].mxu0 }
 0x12b   :  { %v523_v17 = vadd.f32 %v1611_v47, %v291_v46  ;;  %v1716_v35 = vadd.f32 %v1715_v62, %v1714_v12  ;;  %v132_v47 = vsel %vm128_vm2, %v127_v51, %v131_v18 }
 0x12d   :  { %v661_v44 = vadd.f32 %v1646_v57, %v523_v17 }
 0x147   :  { %v1679_v56 = vpop.f32.mrb[4].mxu1 }
 0x148   :  { %v1680_v58 = vpop.f32.mrb[5].mxu1 }
 0x149   :  { %v1681_v2 = vadd.f32 %v1680_v58, %v1679_v56 }
 0x14b   :  { %v769_v42 = vadd.f32 %v1681_v2, %v661_v44 }
 0x14d   :  { %v937_v26 = vadd.f32 %v1716_v35, %v769_v42 }
 0x159   :  { %v1525_v49 = vpop.f32.mrb[4].mxu0 }
 0x15a   :  { %v1847_v37 = vpop.f32.mrb[5].mxu0 }
 0x167   :  { %v1749_v39 = vpop.f32.mrb[6].mxu1 }
 0x168   :  { %v1750_v45 = vpop.f32.mrb[7].mxu1 }
 0x169   :  { %v1751_v57 = vadd.f32 %v1750_v45, %v1749_v39 }
 0x16b   :  { %v1041_v53 = vadd.f32 %v1751_v57, %v937_v26 }
 0x16d   :  { %v2076_v32 = vadd.f32 %v1525_v49, %v1041_v53 }
 0x16f   :  { %vm1529_vm3 = vcmp.ge.f32.partialorder %v2076_v32, 0.0  ;;  %v1532_v46 = vmul.f32 %v2076_v32, %v1531_v41 }
 0x171   :  { %v1533_v12 = vsel %vm1529_vm3, %v2076_v32, %v1532_v46 }
 0x172   :  { %v1534_v62 = vadd.f32 %v1533_v12, %v132_v47 }
 0x174   :  { %1535 = vst [vmem:[%s2695_s7] sm:$0xff] %v1534_v62 }
 0x175   :  { %1540 = vsyncpa [#allocation3], 1 }

</bundles_post_ra>
